<compile_context>
chip_gen: v7x
topology: tpu7x:2x2x1
jax: 0.10.0
libtpu: 0.0.40
codegen_flags: <defaults>
</compile_context>

<pallas_src>
import jax
import jax.numpy as jnp
from jax import lax
from jax.experimental import pallas as pl
from jax.experimental.pallas import tpu as pltpu


def _round_up(x: int, m: int) -> int:
    return -(-x // m) * m


def _vmem_capacity_bytes() -> int:
    try:
        return int(pltpu.get_tpu_info().vmem_capacity_bytes)
    except Exception:
        return 64 * 1024 * 1024      # conservative fallback (v7x per-core VMEM)


# ----------------------------------------------------------------------------
# Pallas kernel: per-slice connected-component count of the gt mask
# (skimage.label(connectivity=1) on a binary mask) + L1 loss between the
# top-k bar lengths and the {1,0} "signs" vector.  One grid step handles
# DG packed groups = DG*P slices; each step writes its own partial-loss block.
# ----------------------------------------------------------------------------
def _make_topo_slice_kernel(H, W, P, DG, K):
    PW = P * W            # lanes per packed row (P slices side by side)
    R = DG * H            # sublane rows per block
    Q = DG * P            # slices handled per block
    BIG = R * PW + 7
    MAX_ITERS = H * W     # safety cap on flood distance (convergence exits early)
    STEPS_PER_CHECK = 16  # unrolled propagation steps between convergence checks

    def kernel(gt_ref, bars_ref, out_ref):
        gt = gt_ref[...]                               # (R, PW) f32 binary mask
        fg = gt > 0.0

        rows = lax.broadcasted_iota(jnp.int32, (R, PW), 0)
        cols = lax.broadcasted_iota(jnp.int32, (R, PW), 1)
        lin = rows * PW + cols                         # unique pixel id in block

        # ---- division-free r % H and c % W (no vector int div/mod on TPU) ----
        r2 = lax.broadcasted_iota(jnp.int32, (R, DG), 0)
        jb = lax.broadcasted_iota(jnp.int32, (R, DG), 1)
        in_blk = (r2 >= jb * H) & (r2 < jb * H + H)
        jr = jnp.sum(jnp.where(in_blk, jb, 0), axis=1, keepdims=True)    # (R,1)
        rin = lax.broadcasted_iota(jnp.int32, (R, 1), 0) - jr * H        # r % H

        c2 = lax.broadcasted_iota(jnp.int32, (P, PW), 1)
        pb = lax.broadcasted_iota(jnp.int32, (P, PW), 0)
        in_sl = (c2 >= pb * W) & (c2 < pb * W + W)
        pc = jnp.sum(jnp.where(in_sl, pb, 0), axis=0, keepdims=True)     # (1,PW)
        cin = lax.broadcasted_iota(jnp.int32, (1, PW), 1) - pc * W       # c % W

        # ---- loop-invariant, full-shape constants hoisted out of the flood ---
        rin_f = jnp.broadcast_to(rin, (R, PW))
        cin_f = jnp.broadcast_to(cin, (R, PW))
        ibig = jnp.int32(BIG)
        izero = jnp.int32(0)
        # wall_* = 0 where the neighbour is inside the slice, BIG at boundaries;
        # max(roll, wall) == where(ok, roll, BIG) since labels are in [0, BIG].
        wall_up = jnp.where(rin_f >= 1, izero, ibig)
        wall_dn = jnp.where(rin_f <= H - 2, izero, ibig)
        wall_lt = jnp.where(cin_f >= 1, izero, ibig)
        wall_rt = jnp.where(cin_f <= W - 2, izero, ibig)
        bg_big = jnp.where(fg, izero, ibig)            # BIG on background pixels
        init_lbl = jnp.where(fg, lin, ibig)

        def prop_once(lbl):
            # neighbour values via XLU rolls; boundaries handled by max-with-wall
            frm_up = jnp.maximum(pltpu.roll(lbl, shift=1, axis=0), wall_up)
            frm_dn = jnp.maximum(pltpu.roll(lbl, shift=R - 1, axis=0), wall_dn)
            frm_lt = jnp.maximum(pltpu.roll(lbl, shift=1, axis=1), wall_lt)
            frm_rt = jnp.maximum(pltpu.roll(lbl, shift=PW - 1, axis=1), wall_rt)
            m = jnp.minimum(jnp.minimum(frm_up, frm_dn),
                            jnp.minimum(frm_lt, frm_rt))
            # background pixels stay at BIG (lbl==BIG there; max(m,BIG)==BIG)
            return jnp.minimum(lbl, jnp.maximum(m, bg_big))

        # min-label flooding with convergence check every STEPS_PER_CHECK steps;
        # blocks with no foreground skip the flood entirely (changed init).
        def cond(state):
            it, _, changed = state
            return jnp.logical_and(changed, it < MAX_ITERS)

        def body(state):
            it, lbl, _ = state
            new = lbl
            for _ in range(STEPS_PER_CHECK):           # static unroll
                new = prop_once(new)
            changed = jnp.max(lbl - new) > 0           # labels only decrease
            return it + STEPS_PER_CHECK, new, changed

        has_fg = jnp.max(gt) > 0.0
        _, labels, _ = lax.while_loop(
            cond, body, (jnp.int32(0), init_lbl, has_fg))

        # a component's "root" is the pixel holding its own (minimal) pixel id
        roots = (fg & (labels == lin)).astype(jnp.bfloat16)              # (R,PW)

        # ---- per-slice component counts via ONE bf16 matmul + lane reduce ----
        # q = j*P + p ; j = group within block, p = slice within group.
        qa = lax.broadcasted_iota(jnp.int32, (Q, DG), 0)
        ja = lax.broadcasted_iota(jnp.int32, (Q, DG), 1)
        a_mask = (qa >= ja * P) & (qa < ja * P + P)
        jq = jnp.sum(jnp.where(a_mask, ja, 0), axis=1, keepdims=True)    # q // P
        qmod = lax.broadcasted_iota(jnp.int32, (Q, 1), 0) - jq * P       # q % P

        r_it = lax.broadcasted_iota(jnp.int32, (Q, R), 1)
        s_row = ((r_it >= jq * H) & (r_it < jq * H + H)).astype(jnp.bfloat16)
        # 0/1 bf16 inputs with f32 accumulation -> exact integer counts
        row_gather = jnp.dot(s_row, roots,
                             preferred_element_type=jnp.float32)        # (Q,PW)

        c_it = lax.broadcasted_iota(jnp.int32, (Q, PW), 1)
        col_mask = ((c_it >= qmod * W) & (c_it < qmod * W + W)).astype(jnp.float32)
        k_gt = jnp.sum(row_gather * col_mask, axis=1, keepdims=True)     # (Q,1)

        # ---- top-k / L1 / masked-sum on the sorted bar lengths ---------------
        bars = bars_ref[...]                          # (Q, K) sorted descending
        lane = lax.broadcasted_iota(jnp.int32, (Q, K), 1).astype(jnp.float32)
        nz = jnp.sum((bars > 0.0).astype(jnp.float32), axis=1, keepdims=True)
        signs = (lane < k_gt).astype(jnp.float32)     # first k_gt bars should be 1
        valid = (lane < nz).astype(jnp.float32)       # signs has length nnz(bars)
        per_slice = jnp.sum(jnp.abs(bars - signs) * valid, axis=1, keepdims=True)
        per_slice = jnp.where(k_gt > 0.0, per_slice, 0.0)   # empty gt slice -> 0
        total = jnp.sum(per_slice)                    # scalar partial for block

        # lane-dense (8,128) output tile; partial read back at [b, 0, 0]
        out_ref[...] = total + jnp.zeros((1, 8, 128), jnp.float32)

    return kernel


# ----------------------------------------------------------------------------
# Plain-JAX glue: 0-dim superlevel-set persistence bar lengths of one slice.
# Union-find over vertices processed in decreasing value order (elder rule).
# Edges: 4-neighbours + the main diagonal of every unit square (1-skeleton of
# the Freudenthal triangulation used by LevelSetLayer2D).
# TODO(synk): sequential, value-sorted union-find persistence has no clean
# Pallas equivalent; it is kept in plain JAX (lax loops) and vmapped over D.
# ----------------------------------------------------------------------------
def _superlevel_0dim_bars(f2d):
    H, W = f2d.shape
    N = H * W
    vals = f2d.reshape(N).astype(jnp.float32)
    order = jnp.argsort(-vals).astype(jnp.int32)     # decreasing value order

    rr = jnp.arange(N, dtype=jnp.int32) // W
    cc = jnp.arange(N, dtype=jnp.int32) % W
    offs = ((-1, 0), (1, 0), (0, -1), (0, 1), (1, 1), (-1, -1))
    nbr_idx, nbr_ok = [], []
    for dr, dc in offs:
        r2, c2 = rr + dr, cc + dc
        ok = (r2 >= 0) & (r2 < H) & (c2 >= 0) & (c2 < W)
        nbr_idx.append(jnp.clip(r2, 0, H - 1) * W + jnp.clip(c2, 0, W - 1))
        nbr_ok.append(ok)
    nbr_idx = jnp.stack(nbr_idx, axis=1)             # (N, 6)
    nbr_ok = jnp.stack(nbr_ok, axis=1)               # (N, 6)

    def find_root(parent, i):
        # path-halving find: jump to the grandparent and write it back
        def cond(st):
            p, j = st
            return p[j] != j

        def body(st):
            p, j = st
            gp = p[p[j]]
            p = p.at[j].set(gp)
            return p, gp

        return lax.while_loop(cond, body, (parent, i))

    def vertex_step(t, state):
        parent, processed, bars, nbars = state
        v = order[t]
        val = vals[v]

        def nb_step(k, st):
            parent, rv, processed, bars, nbars = st
            u = nbr_idx[v, k]
            ok = nbr_ok[v, k] & processed[u]
            parent, ru = find_root(parent, u)        # rv carried, not recomputed
            merge = ok & (ru != rv)
            rv_elder = vals[rv] >= vals[ru]          # root value == component birth
            surv = jnp.where(rv_elder, rv, ru)
            dying = jnp.where(rv_elder, ru, rv)
            bar_len = vals[dying] - val              # birth - death (superlevel)
            parent = parent.at[dying].set(jnp.where(merge, surv, parent[dying]))
            bars = bars.at[nbars].set(jnp.where(merge, bar_len, bars[nbars]))
            nbars = nbars + merge.astype(jnp.int32)
            rv = jnp.where(merge, surv, rv)          # new root of v's component
            return parent, rv, processed, bars, nbars

        parent, _, processed, bars, nbars = lax.fori_loop(
            0, len(offs), nb_step, (parent, v, processed, bars, nbars))
        processed = processed.at[v].set(True)
        return parent, processed, bars, nbars

    state0 = (jnp.arange(N, dtype=jnp.int32),
              jnp.zeros((N,), dtype=jnp.bool_),
              jnp.zeros((N,), dtype=jnp.float32),
              jnp.int32(0))
    _, _, bars, _ = lax.fori_loop(0, N, vertex_step, state0)
    return bars                                      # (N,) finite bar lengths


@jax.jit
def _topo3d_loss(patch3d, mask3d):
    D, H, W = patch3d.shape
    pred = patch3d.astype(jnp.float32)
    # mirrors `mask3d.to(torch.uint8)`; any nonzero value is foreground
    # (assumes a binary mask, matching skimage.label on {0,1} inputs)
    gt_bin = (mask3d.astype(jnp.uint8) != 0).astype(jnp.float32)

    # --- 0-dim superlevel persistence bars per slice (plain JAX, vmapped) ----
    bars_all = jax.vmap(_superlevel_0dim_bars)(pred)          # (D, H*W)
    bars_all = -jnp.sort(-bars_all, axis=-1)                  # descending sort

    # provably-safe truncation: #finite bars < independence number of the
    # triangulated grid graph <= min(ceil(W/2)*H, ceil(H/2)*W)
    NB = H * W
    max_bars = min(((W + 1) // 2) * H, ((H + 1) // 2) * W)
    K = min(NB, max(128, _round_up(max_bars, 128)))
    if K < NB:
        bars_all = bars_all[:, :K]
    else:
        K = NB

    # --- lane-dense packing: pad W to a power of two (divisor of 128) or a
    #     multiple of 128, then pack P slices side-by-side along the lanes -----
    if W < 128:
        Wp = 1
        while Wp < W:
            Wp *= 2
    else:
        Wp = _round_up(W, 128)
    P = max(1, 128 // Wp)
    PW = P * Wp
    NG = -(-D // P)                                           # packed groups

    # groups per grid step: per-generation VMEM budget (double-buffered inputs),
    # bounded so in-kernel selector/flood scratch stays small, and capped so the
    # grid has >= 2 steps when NG >= 2 (keeps both v7x TensorCores busy; ~free
    # elsewhere since per-step overhead is ~0.35 us).
    vmem_cap = _vmem_capacity_bytes()
    per_group_bytes = (H * PW + P * K) * 4
    budget = max(8 << 20, vmem_cap // 2 - (8 << 20))
    dg_cap = max(1, min(NG, budget // max(1, 2 * per_group_bytes)))
    dg_cap = min(dg_cap, max(1, 1024 // H), max(1, 1024 // P))
    if NG >= 2:
        dg_cap = min(dg_cap, -(-NG // 2))
    DG = NG                              # fallback: full-array block (always legal)
    for d in range(dg_cap, 0, -1):
        if d == NG or ((d * H) % 8 == 0 and (d * P) % 8 == 0):
            DG = d
            break
    NGp = _round_up(NG, DG)
    NBLK = NGp // DG
    Dp = NGp * P

    gt_p = jnp.pad(gt_bin, ((0, Dp - D), (0, 0), (0, Wp - W)))
    gt_packed = (gt_p.reshape(NGp, P, H, Wp)
                 .transpose(0, 2, 1, 3)
                 .reshape(NGp * H, PW))
    bars_p = jnp.pad(bars_all, ((0, Dp - D), (0, 0)))         # (Dp, K)

    vmem_limit = int(min(vmem_cap - (8 << 20),
                         max(32 << 20, 2 * DG * per_group_bytes + (4 << 20))))

    kernel = _make_topo_slice_kernel(H, Wp, P, DG, K)
    partials = pl.pallas_call(
        kernel,
        out_shape=jax.ShapeDtypeStruct((NBLK, 8, 128), jnp.float32),
        grid_spec=pltpu.PrefetchScalarGridSpec(
            num_scalar_prefetch=0,
            grid=(NBLK,),
            in_specs=[pl.BlockSpec((DG * H, PW), lambda b: (b, 0)),
                      pl.BlockSpec((DG * P, K), lambda b: (b, 0))],
            out_specs=pl.BlockSpec((1, 8, 128), lambda b: (b, 0, 0))),
        compiler_params=pltpu.CompilerParams(
            dimension_semantics=("parallel",),
            vmem_limit_bytes=vmem_limit),
    )(gt_packed, bars_p)
    return jnp.sum(partials[:, 0, 0])


class Topo3DLossRotatingAxisPallas:
    """Forward-only port of Topo3DLossRotatingAxis (no learnable parameters).
    # TODO(synk): the autograd.Function backward path (ctx.grads) and the
    # multiprocessing pool have no kernel equivalent; only forward is ported.
    """

    def __init__(self, num_processes: int = 1):
        del num_processes        # the spawn pool is replaced by on-device compute
        self.axis = 0

    def __call__(self, patch3d, mask3d):
        axis = self.axis = (self.axis + 1) % 3
        if axis != 0:
            patch3d = jnp.swapaxes(patch3d, 0, axis)
            mask3d = jnp.swapaxes(mask3d, 0, axis)
        return _topo3d_loss(patch3d, mask3d)


if __name__ == "__main__":
    key = jax.random.PRNGKey(0)
    k1, k2 = jax.random.split(key)
    D = H = W = 16
    patch3d = jax.random.uniform(k1, (D, H, W), dtype=jnp.float32)
    mask3d = (jax.random.uniform(k2, (D, H, W)) > 0.7).astype(jnp.float32)

    loss_fn = Topo3DLossRotatingAxisPallas(num_processes=1)
    loss = loss_fn(patch3d, mask3d)      # first call -> axis == 1, like the reference
    jax.block_until_ready(loss)
    print("KERNEL_OK")
</pallas_src>

<mosaic_0001>
module attributes {stable_mosaic.version = 11 : i64} {
  func.func @kernel(%arg0: i32, %arg1: memref<16x128xf32, #tpu.memory_space<vmem>>, %arg2: memref<8x128xf32, #tpu.memory_space<vmem>>, %arg3: memref<1x8x128xf32, #tpu.memory_space<vmem>>) attributes {dimension_semantics = [#tpu.dimension_semantics<parallel>], iteration_bounds = array<i64: 2>, scalar_prefetch = 0 : i64, scratch_operands = 0 : i64, tpu.core_type = #tpu.core_type<tc>, window_params = [{transform_indices = @transform_0, window_bounds = array<i64: 16, 128>}, {transform_indices = @transform_1, window_bounds = array<i64: 8, 128>}, {transform_indices = @transform_2, window_bounds = array<i64: 1, 8, 128>}]} {
    %c0 = arith.constant 0 : index
    %c0_0 = arith.constant 0 : index
    %0 = vector.load %arg1[%c0, %c0_0] : memref<16x128xf32, #tpu.memory_space<vmem>>, vector<16x128xf32>
    %cst = arith.constant 0.000000e+00 : f32
    %1 = vector.broadcast %cst : f32 to vector<16x128xf32>
    %2 = arith.cmpf ogt, %0, %1 : vector<16x128xf32>
    %3 = tpu.iota {dimensions = array<i32: 0>} : vector<16x128xi32>
    %4 = tpu.iota {dimensions = array<i32: 1>} : vector<16x128xi32>
    %c128_i32 = arith.constant 128 : i32
    %5 = vector.broadcast %c128_i32 : i32 to vector<16x128xi32>
    %6 = arith.muli %3, %5 : vector<16x128xi32>
    %7 = arith.addi %6, %4 : vector<16x128xi32>
    %8 = tpu.iota {dimensions = array<i32: 0>} : vector<16x1xi32>
    %9 = tpu.iota {dimensions = array<i32: 1>} : vector<16x1xi32>
    %c16_i32 = arith.constant 16 : i32
    %10 = vector.broadcast %c16_i32 : i32 to vector<16x1xi32>
    %11 = arith.muli %9, %10 : vector<16x1xi32>
    %12 = arith.cmpi sge, %8, %11 : vector<16x1xi32>
    %c16_i32_1 = arith.constant 16 : i32
    %13 = vector.broadcast %c16_i32_1 : i32 to vector<16x1xi32>
    %14 = arith.muli %9, %13 : vector<16x1xi32>
    %c16_i32_2 = arith.constant 16 : i32
    %15 = vector.broadcast %c16_i32_2 : i32 to vector<16x1xi32>
    %16 = arith.addi %14, %15 : vector<16x1xi32>
    %17 = arith.cmpi slt, %8, %16 : vector<16x1xi32>
    %18 = arith.andi %12, %17 : vector<16x1xi1>
    %c0_i32 = arith.constant 0 : i32
    %19 = vector.broadcast %c0_i32 : i32 to vector<16x1xi32>
    %20 = arith.select %18, %9, %19 : vector<16x1xi1>, vector<16x1xi32>
    %cst_3 = arith.constant dense<0> : vector<16xi32>
    %21 = vector.multi_reduction <add>, %20, %cst_3 [1] : vector<16x1xi32> to vector<16xi32>
    %22 = vector.shape_cast %21 : vector<16xi32> to vector<16x1xi32>
    %23 = tpu.iota {dimensions = array<i32: 0>} : vector<16x1xi32>
    %c16_i32_4 = arith.constant 16 : i32
    %24 = vector.broadcast %c16_i32_4 : i32 to vector<16x1xi32>
    %25 = arith.muli %22, %24 : vector<16x1xi32>
    %26 = arith.subi %23, %25 : vector<16x1xi32>
    %27 = tpu.iota {dimensions = array<i32: 1>} : vector<8x128xi32>
    %28 = tpu.iota {dimensions = array<i32: 0>} : vector<8x128xi32>
    %c16_i32_5 = arith.constant 16 : i32
    %29 = vector.broadcast %c16_i32_5 : i32 to vector<8x128xi32>
    %30 = arith.muli %28, %29 : vector<8x128xi32>
    %31 = arith.cmpi sge, %27, %30 : vector<8x128xi32>
    %c16_i32_6 = arith.constant 16 : i32
    %32 = vector.broadcast %c16_i32_6 : i32 to vector<8x128xi32>
    %33 = arith.muli %28, %32 : vector<8x128xi32>
    %c16_i32_7 = arith.constant 16 : i32
    %34 = vector.broadcast %c16_i32_7 : i32 to vector<8x128xi32>
    %35 = arith.addi %33, %34 : vector<8x128xi32>
    %36 = arith.cmpi slt, %27, %35 : vector<8x128xi32>
    %37 = arith.andi %31, %36 : vector<8x128xi1>
    %c0_i32_8 = arith.constant 0 : i32
    %38 = vector.broadcast %c0_i32_8 : i32 to vector<8x128xi32>
    %39 = arith.select %37, %28, %38 : vector<8x128xi1>, vector<8x128xi32>
    %cst_9 = arith.constant dense<0> : vector<128xi32>
    %40 = vector.multi_reduction <add>, %39, %cst_9 [0] : vector<8x128xi32> to vector<128xi32>
    %41 = vector.shape_cast %40 : vector<128xi32> to vector<1x128xi32>
    %42 = tpu.iota {dimensions = array<i32: 1>} : vector<1x128xi32>
    %c16_i32_10 = arith.constant 16 : i32
    %43 = vector.broadcast %c16_i32_10 : i32 to vector<1x128xi32>
    %44 = arith.muli %41, %43 : vector<1x128xi32>
    %45 = arith.subi %42, %44 : vector<1x128xi32>
    %46 = vector.shape_cast %26 : vector<16x1xi32> to vector<16x1xi32>
    %47 = vector.broadcast %46 : vector<16x1xi32> to vector<16x128xi32>
    %48 = vector.shape_cast %45 : vector<1x128xi32> to vector<1x128xi32>
    %49 = vector.broadcast %48 : vector<1x128xi32> to vector<16x128xi32>
    %c1_i32 = arith.constant 1 : i32
    %50 = vector.broadcast %c1_i32 : i32 to vector<16x128xi32>
    %51 = arith.cmpi sge, %47, %50 : vector<16x128xi32>
    %c0_i32_11 = arith.constant 0 : i32
    %c2055_i32 = arith.constant 2055 : i32
    %52 = vector.broadcast %c0_i32_11 : i32 to vector<16x128xi32>
    %53 = vector.broadcast %c2055_i32 : i32 to vector<16x128xi32>
    %54 = arith.select %51, %52, %53 : vector<16x128xi1>, vector<16x128xi32>
    %c14_i32 = arith.constant 14 : i32
    %55 = vector.broadcast %c14_i32 : i32 to vector<16x128xi32>
    %56 = arith.cmpi sle, %47, %55 : vector<16x128xi32>
    %c0_i32_12 = arith.constant 0 : i32
    %c2055_i32_13 = arith.constant 2055 : i32
    %57 = vector.broadcast %c0_i32_12 : i32 to vector<16x128xi32>
    %58 = vector.broadcast %c2055_i32_13 : i32 to vector<16x128xi32>
    %59 = arith.select %56, %57, %58 : vector<16x128xi1>, vector<16x128xi32>
    %c1_i32_14 = arith.constant 1 : i32
    %60 = vector.broadcast %c1_i32_14 : i32 to vector<16x128xi32>
    %61 = arith.cmpi sge, %49, %60 : vector<16x128xi32>
    %c0_i32_15 = arith.constant 0 : i32
    %c2055_i32_16 = arith.constant 2055 : i32
    %62 = vector.broadcast %c0_i32_15 : i32 to vector<16x128xi32>
    %63 = vector.broadcast %c2055_i32_16 : i32 to vector<16x128xi32>
    %64 = arith.select %61, %62, %63 : vector<16x128xi1>, vector<16x128xi32>
    %c14_i32_17 = arith.constant 14 : i32
    %65 = vector.broadcast %c14_i32_17 : i32 to vector<16x128xi32>
    %66 = arith.cmpi sle, %49, %65 : vector<16x128xi32>
    %c0_i32_18 = arith.constant 0 : i32
    %c2055_i32_19 = arith.constant 2055 : i32
    %67 = vector.broadcast %c0_i32_18 : i32 to vector<16x128xi32>
    %68 = vector.broadcast %c2055_i32_19 : i32 to vector<16x128xi32>
    %69 = arith.select %66, %67, %68 : vector<16x128xi1>, vector<16x128xi32>
    %c0_i32_20 = arith.constant 0 : i32
    %c2055_i32_21 = arith.constant 2055 : i32
    %70 = vector.broadcast %c0_i32_20 : i32 to vector<16x128xi32>
    %71 = vector.broadcast %c2055_i32_21 : i32 to vector<16x128xi32>
    %72 = arith.select %2, %70, %71 : vector<16x128xi1>, vector<16x128xi32>
    %c2055_i32_22 = arith.constant 2055 : i32
    %73 = vector.broadcast %c2055_i32_22 : i32 to vector<16x128xi32>
    %74 = arith.select %2, %7, %73 : vector<16x128xi1>, vector<16x128xi32>
    %75 = vector.shape_cast %0 : vector<16x128xf32> to vector<1x16x128xf32>
    %cst_23 = arith.constant dense<0xFF800000> : vector<1xf32>
    %76 = vector.multi_reduction <maximumf>, %75, %cst_23 [1, 2] : vector<1x16x128xf32> to vector<1xf32>
    %77 = vector.shape_cast %76 : vector<1xf32> to vector<1x1x1xf32>
    %78 = vector.extract %77[0, 0, 0] : f32 from vector<1x1x1xf32>
    %cst_24 = arith.constant 0.000000e+00 : f32
    %79 = arith.cmpf ogt, %78, %cst_24 : f32
    %c0_i32_25 = arith.constant 0 : i32
    %80:3 = scf.while (%arg4 = %c0_i32_25, %arg5 = %74, %arg6 = %79) : (i32, vector<16x128xi32>, i1) -> (i32, vector<16x128xi32>, i1) {
      %c256_i32 = arith.constant 256 : i32
      %172 = arith.cmpi slt, %arg4, %c256_i32 : i32
      %173 = arith.andi %arg6, %172 : i1
      scf.condition(%173) %arg4, %arg5, %arg6 : i32, vector<16x128xi32>, i1
    } do {
    ^bb0(%arg4: i32, %arg5: vector<16x128xi32>, %arg6: i1):
      %c1_i32_51 = arith.constant 1 : i32
      %172 = tpu.dynamic_rotate %arg5 by %c1_i32_51 dim 0 : vector<16x128xi32>, i32 -> vector<16x128xi32>
      %173 = arith.maxsi %172, %54 : vector<16x128xi32>
      %c15_i32 = arith.constant 15 : i32
      %174 = tpu.dynamic_rotate %arg5 by %c15_i32 dim 0 : vector<16x128xi32>, i32 -> vector<16x128xi32>
      %175 = arith.maxsi %174, %59 : vector<16x128xi32>
      %c1_i32_52 = arith.constant 1 : i32
      %176 = tpu.dynamic_rotate %arg5 by %c1_i32_52 dim 1 : vector<16x128xi32>, i32 -> vector<16x128xi32>
      %177 = arith.maxsi %176, %64 : vector<16x128xi32>
      %c127_i32 = arith.constant 127 : i32
      %178 = tpu.dynamic_rotate %arg5 by %c127_i32 dim 1 : vector<16x128xi32>, i32 -> vector<16x128xi32>
      %179 = arith.maxsi %178, %69 : vector<16x128xi32>
      %180 = arith.minsi %173, %175 : vector<16x128xi32>
      %181 = arith.minsi %177, %179 : vector<16x128xi32>
      %182 = arith.minsi %180, %181 : vector<16x128xi32>
      %183 = arith.maxsi %182, %72 : vector<16x128xi32>
      %184 = arith.minsi %arg5, %183 : vector<16x128xi32>
      %c1_i32_53 = arith.constant 1 : i32
      %185 = tpu.dynamic_rotate %184 by %c1_i32_53 dim 0 : vector<16x128xi32>, i32 -> vector<16x128xi32>
      %186 = arith.maxsi %185, %54 : vector<16x128xi32>
      %c15_i32_54 = arith.constant 15 : i32
      %187 = tpu.dynamic_rotate %184 by %c15_i32_54 dim 0 : vector<16x128xi32>, i32 -> vector<16x128xi32>
      %188 = arith.maxsi %187, %59 : vector<16x128xi32>
      %c1_i32_55 = arith.constant 1 : i32
      %189 = tpu.dynamic_rotate %184 by %c1_i32_55 dim 1 : vector<16x128xi32>, i32 -> vector<16x128xi32>
      %190 = arith.maxsi %189, %64 : vector<16x128xi32>
      %c127_i32_56 = arith.constant 127 : i32
      %191 = tpu.dynamic_rotate %184 by %c127_i32_56 dim 1 : vector<16x128xi32>, i32 -> vector<16x128xi32>
      %192 = arith.maxsi %191, %69 : vector<16x128xi32>
      %193 = arith.minsi %186, %188 : vector<16x128xi32>
      %194 = arith.minsi %190, %192 : vector<16x128xi32>
      %195 = arith.minsi %193, %194 : vector<16x128xi32>
      %196 = arith.maxsi %195, %72 : vector<16x128xi32>
      %197 = arith.minsi %184, %196 : vector<16x128xi32>
      %c1_i32_57 = arith.constant 1 : i32
      %198 = tpu.dynamic_rotate %197 by %c1_i32_57 dim 0 : vector<16x128xi32>, i32 -> vector<16x128xi32>
      %199 = arith.maxsi %198, %54 : vector<16x128xi32>
      %c15_i32_58 = arith.constant 15 : i32
      %200 = tpu.dynamic_rotate %197 by %c15_i32_58 dim 0 : vector<16x128xi32>, i32 -> vector<16x128xi32>
      %201 = arith.maxsi %200, %59 : vector<16x128xi32>
      %c1_i32_59 = arith.constant 1 : i32
      %202 = tpu.dynamic_rotate %197 by %c1_i32_59 dim 1 : vector<16x128xi32>, i32 -> vector<16x128xi32>
      %203 = arith.maxsi %202, %64 : vector<16x128xi32>
      %c127_i32_60 = arith.constant 127 : i32
      %204 = tpu.dynamic_rotate %197 by %c127_i32_60 dim 1 : vector<16x128xi32>, i32 -> vector<16x128xi32>
      %205 = arith.maxsi %204, %69 : vector<16x128xi32>
      %206 = arith.minsi %199, %201 : vector<16x128xi32>
      %207 = arith.minsi %203, %205 : vector<16x128xi32>
      %208 = arith.minsi %206, %207 : vector<16x128xi32>
      %209 = arith.maxsi %208, %72 : vector<16x128xi32>
      %210 = arith.minsi %197, %209 : vector<16x128xi32>
      %c1_i32_61 = arith.constant 1 : i32
      %211 = tpu.dynamic_rotate %210 by %c1_i32_61 dim 0 : vector<16x128xi32>, i32 -> vector<16x128xi32>
      %212 = arith.maxsi %211, %54 : vector<16x128xi32>
      %c15_i32_62 = arith.constant 15 : i32
      %213 = tpu.dynamic_rotate %210 by %c15_i32_62 dim 0 : vector<16x128xi32>, i32 -> vector<16x128xi32>
      %214 = arith.maxsi %213, %59 : vector<16x128xi32>
      %c1_i32_63 = arith.constant 1 : i32
      %215 = tpu.dynamic_rotate %210 by %c1_i32_63 dim 1 : vector<16x128xi32>, i32 -> vector<16x128xi32>
      %216 = arith.maxsi %215, %64 : vector<16x128xi32>
      %c127_i32_64 = arith.constant 127 : i32
      %217 = tpu.dynamic_rotate %210 by %c127_i32_64 dim 1 : vector<16x128xi32>, i32 -> vector<16x128xi32>
      %218 = arith.maxsi %217, %69 : vector<16x128xi32>
      %219 = arith.minsi %212, %214 : vector<16x128xi32>
      %220 = arith.minsi %216, %218 : vector<16x128xi32>
      %221 = arith.minsi %219, %220 : vector<16x128xi32>
      %222 = arith.maxsi %221, %72 : vector<16x128xi32>
      %223 = arith.minsi %210, %222 : vector<16x128xi32>
      %c1_i32_65 = arith.constant 1 : i32
      %224 = tpu.dynamic_rotate %223 by %c1_i32_65 dim 0 : vector<16x128xi32>, i32 -> vector<16x128xi32>
      %225 = arith.maxsi %224, %54 : vector<16x128xi32>
      %c15_i32_66 = arith.constant 15 : i32
      %226 = tpu.dynamic_rotate %223 by %c15_i32_66 dim 0 : vector<16x128xi32>, i32 -> vector<16x128xi32>
      %227 = arith.maxsi %226, %59 : vector<16x128xi32>
      %c1_i32_67 = arith.constant 1 : i32
      %228 = tpu.dynamic_rotate %223 by %c1_i32_67 dim 1 : vector<16x128xi32>, i32 -> vector<16x128xi32>
      %229 = arith.maxsi %228, %64 : vector<16x128xi32>
      %c127_i32_68 = arith.constant 127 : i32
      %230 = tpu.dynamic_rotate %223 by %c127_i32_68 dim 1 : vector<16x128xi32>, i32 -> vector<16x128xi32>
      %231 = arith.maxsi %230, %69 : vector<16x128xi32>
      %232 = arith.minsi %225, %227 : vector<16x128xi32>
      %233 = arith.minsi %229, %231 : vector<16x128xi32>
      %234 = arith.minsi %232, %233 : vector<16x128xi32>
      %235 = arith.maxsi %234, %72 : vector<16x128xi32>
      %236 = arith.minsi %223, %235 : vector<16x128xi32>
      %c1_i32_69 = arith.constant 1 : i32
      %237 = tpu.dynamic_rotate %236 by %c1_i32_69 dim 0 : vector<16x128xi32>, i32 -> vector<16x128xi32>
      %238 = arith.maxsi %237, %54 : vector<16x128xi32>
      %c15_i32_70 = arith.constant 15 : i32
      %239 = tpu.dynamic_rotate %236 by %c15_i32_70 dim 0 : vector<16x128xi32>, i32 -> vector<16x128xi32>
      %240 = arith.maxsi %239, %59 : vector<16x128xi32>
      %c1_i32_71 = arith.constant 1 : i32
      %241 = tpu.dynamic_rotate %236 by %c1_i32_71 dim 1 : vector<16x128xi32>, i32 -> vector<16x128xi32>
      %242 = arith.maxsi %241, %64 : vector<16x128xi32>
      %c127_i32_72 = arith.constant 127 : i32
      %243 = tpu.dynamic_rotate %236 by %c127_i32_72 dim 1 : vector<16x128xi32>, i32 -> vector<16x128xi32>
      %244 = arith.maxsi %243, %69 : vector<16x128xi32>
      %245 = arith.minsi %238, %240 : vector<16x128xi32>
      %246 = arith.minsi %242, %244 : vector<16x128xi32>
      %247 = arith.minsi %245, %246 : vector<16x128xi32>
      %248 = arith.maxsi %247, %72 : vector<16x128xi32>
      %249 = arith.minsi %236, %248 : vector<16x128xi32>
      %c1_i32_73 = arith.constant 1 : i32
      %250 = tpu.dynamic_rotate %249 by %c1_i32_73 dim 0 : vector<16x128xi32>, i32 -> vector<16x128xi32>
      %251 = arith.maxsi %250, %54 : vector<16x128xi32>
      %c15_i32_74 = arith.constant 15 : i32
      %252 = tpu.dynamic_rotate %249 by %c15_i32_74 dim 0 : vector<16x128xi32>, i32 -> vector<16x128xi32>
      %253 = arith.maxsi %252, %59 : vector<16x128xi32>
      %c1_i32_75 = arith.constant 1 : i32
      %254 = tpu.dynamic_rotate %249 by %c1_i32_75 dim 1 : vector<16x128xi32>, i32 -> vector<16x128xi32>
      %255 = arith.maxsi %254, %64 : vector<16x128xi32>
      %c127_i32_76 = arith.constant 127 : i32
      %256 = tpu.dynamic_rotate %249 by %c127_i32_76 dim 1 : vector<16x128xi32>, i32 -> vector<16x128xi32>
      %257 = arith.maxsi %256, %69 : vector<16x128xi32>
      %258 = arith.minsi %251, %253 : vector<16x128xi32>
      %259 = arith.minsi %255, %257 : vector<16x128xi32>
      %260 = arith.minsi %258, %259 : vector<16x128xi32>
      %261 = arith.maxsi %260, %72 : vector<16x128xi32>
      %262 = arith.minsi %249, %261 : vector<16x128xi32>
      %c1_i32_77 = arith.constant 1 : i32
      %263 = tpu.dynamic_rotate %262 by %c1_i32_77 dim 0 : vector<16x128xi32>, i32 -> vector<16x128xi32>
      %264 = arith.maxsi %263, %54 : vector<16x128xi32>
      %c15_i32_78 = arith.constant 15 : i32
      %265 = tpu.dynamic_rotate %262 by %c15_i32_78 dim 0 : vector<16x128xi32>, i32 -> vector<16x128xi32>
      %266 = arith.maxsi %265, %59 : vector<16x128xi32>
      %c1_i32_79 = arith.constant 1 : i32
      %267 = tpu.dynamic_rotate %262 by %c1_i32_79 dim 1 : vector<16x128xi32>, i32 -> vector<16x128xi32>
      %268 = arith.maxsi %267, %64 : vector<16x128xi32>
      %c127_i32_80 = arith.constant 127 : i32
      %269 = tpu.dynamic_rotate %262 by %c127_i32_80 dim 1 : vector<16x128xi32>, i32 -> vector<16x128xi32>
      %270 = arith.maxsi %269, %69 : vector<16x128xi32>
      %271 = arith.minsi %264, %266 : vector<16x128xi32>
      %272 = arith.minsi %268, %270 : vector<16x128xi32>
      %273 = arith.minsi %271, %272 : vector<16x128xi32>
      %274 = arith.maxsi %273, %72 : vector<16x128xi32>
      %275 = arith.minsi %262, %274 : vector<16x128xi32>
      %c1_i32_81 = arith.constant 1 : i32
      %276 = tpu.dynamic_rotate %275 by %c1_i32_81 dim 0 : vector<16x128xi32>, i32 -> vector<16x128xi32>
      %277 = arith.maxsi %276, %54 : vector<16x128xi32>
      %c15_i32_82 = arith.constant 15 : i32
      %278 = tpu.dynamic_rotate %275 by %c15_i32_82 dim 0 : vector<16x128xi32>, i32 -> vector<16x128xi32>
      %279 = arith.maxsi %278, %59 : vector<16x128xi32>
      %c1_i32_83 = arith.constant 1 : i32
      %280 = tpu.dynamic_rotate %275 by %c1_i32_83 dim 1 : vector<16x128xi32>, i32 -> vector<16x128xi32>
      %281 = arith.maxsi %280, %64 : vector<16x128xi32>
      %c127_i32_84 = arith.constant 127 : i32
      %282 = tpu.dynamic_rotate %275 by %c127_i32_84 dim 1 : vector<16x128xi32>, i32 -> vector<16x128xi32>
      %283 = arith.maxsi %282, %69 : vector<16x128xi32>
      %284 = arith.minsi %277, %279 : vector<16x128xi32>
      %285 = arith.minsi %281, %283 : vector<16x128xi32>
      %286 = arith.minsi %284, %285 : vector<16x128xi32>
      %287 = arith.maxsi %286, %72 : vector<16x128xi32>
      %288 = arith.minsi %275, %287 : vector<16x128xi32>
      %c1_i32_85 = arith.constant 1 : i32
      %289 = tpu.dynamic_rotate %288 by %c1_i32_85 dim 0 : vector<16x128xi32>, i32 -> vector<16x128xi32>
      %290 = arith.maxsi %289, %54 : vector<16x128xi32>
      %c15_i32_86 = arith.constant 15 : i32
      %291 = tpu.dynamic_rotate %288 by %c15_i32_86 dim 0 : vector<16x128xi32>, i32 -> vector<16x128xi32>
      %292 = arith.maxsi %291, %59 : vector<16x128xi32>
      %c1_i32_87 = arith.constant 1 : i32
      %293 = tpu.dynamic_rotate %288 by %c1_i32_87 dim 1 : vector<16x128xi32>, i32 -> vector<16x128xi32>
      %294 = arith.maxsi %293, %64 : vector<16x128xi32>
      %c127_i32_88 = arith.constant 127 : i32
      %295 = tpu.dynamic_rotate %288 by %c127_i32_88 dim 1 : vector<16x128xi32>, i32 -> vector<16x128xi32>
      %296 = arith.maxsi %295, %69 : vector<16x128xi32>
      %297 = arith.minsi %290, %292 : vector<16x128xi32>
      %298 = arith.minsi %294, %296 : vector<16x128xi32>
      %299 = arith.minsi %297, %298 : vector<16x128xi32>
      %300 = arith.maxsi %299, %72 : vector<16x128xi32>
      %301 = arith.minsi %288, %300 : vector<16x128xi32>
      %c1_i32_89 = arith.constant 1 : i32
      %302 = tpu.dynamic_rotate %301 by %c1_i32_89 dim 0 : vector<16x128xi32>, i32 -> vector<16x128xi32>
      %303 = arith.maxsi %302, %54 : vector<16x128xi32>
      %c15_i32_90 = arith.constant 15 : i32
      %304 = tpu.dynamic_rotate %301 by %c15_i32_90 dim 0 : vector<16x128xi32>, i32 -> vector<16x128xi32>
      %305 = arith.maxsi %304, %59 : vector<16x128xi32>
      %c1_i32_91 = arith.constant 1 : i32
      %306 = tpu.dynamic_rotate %301 by %c1_i32_91 dim 1 : vector<16x128xi32>, i32 -> vector<16x128xi32>
      %307 = arith.maxsi %306, %64 : vector<16x128xi32>
      %c127_i32_92 = arith.constant 127 : i32
      %308 = tpu.dynamic_rotate %301 by %c127_i32_92 dim 1 : vector<16x128xi32>, i32 -> vector<16x128xi32>
      %309 = arith.maxsi %308, %69 : vector<16x128xi32>
      %310 = arith.minsi %303, %305 : vector<16x128xi32>
      %311 = arith.minsi %307, %309 : vector<16x128xi32>
      %312 = arith.minsi %310, %311 : vector<16x128xi32>
      %313 = arith.maxsi %312, %72 : vector<16x128xi32>
      %314 = arith.minsi %301, %313 : vector<16x128xi32>
      %c1_i32_93 = arith.constant 1 : i32
      %315 = tpu.dynamic_rotate %314 by %c1_i32_93 dim 0 : vector<16x128xi32>, i32 -> vector<16x128xi32>
      %316 = arith.maxsi %315, %54 : vector<16x128xi32>
      %c15_i32_94 = arith.constant 15 : i32
      %317 = tpu.dynamic_rotate %314 by %c15_i32_94 dim 0 : vector<16x128xi32>, i32 -> vector<16x128xi32>
      %318 = arith.maxsi %317, %59 : vector<16x128xi32>
      %c1_i32_95 = arith.constant 1 : i32
      %319 = tpu.dynamic_rotate %314 by %c1_i32_95 dim 1 : vector<16x128xi32>, i32 -> vector<16x128xi32>
      %320 = arith.maxsi %319, %64 : vector<16x128xi32>
      %c127_i32_96 = arith.constant 127 : i32
      %321 = tpu.dynamic_rotate %314 by %c127_i32_96 dim 1 : vector<16x128xi32>, i32 -> vector<16x128xi32>
      %322 = arith.maxsi %321, %69 : vector<16x128xi32>
      %323 = arith.minsi %316, %318 : vector<16x128xi32>
      %324 = arith.minsi %320, %322 : vector<16x128xi32>
      %325 = arith.minsi %323, %324 : vector<16x128xi32>
      %326 = arith.maxsi %325, %72 : vector<16x128xi32>
      %327 = arith.minsi %314, %326 : vector<16x128xi32>
      %c1_i32_97 = arith.constant 1 : i32
      %328 = tpu.dynamic_rotate %327 by %c1_i32_97 dim 0 : vector<16x128xi32>, i32 -> vector<16x128xi32>
      %329 = arith.maxsi %328, %54 : vector<16x128xi32>
      %c15_i32_98 = arith.constant 15 : i32
      %330 = tpu.dynamic_rotate %327 by %c15_i32_98 dim 0 : vector<16x128xi32>, i32 -> vector<16x128xi32>
      %331 = arith.maxsi %330, %59 : vector<16x128xi32>
      %c1_i32_99 = arith.constant 1 : i32
      %332 = tpu.dynamic_rotate %327 by %c1_i32_99 dim 1 : vector<16x128xi32>, i32 -> vector<16x128xi32>
      %333 = arith.maxsi %332, %64 : vector<16x128xi32>
      %c127_i32_100 = arith.constant 127 : i32
      %334 = tpu.dynamic_rotate %327 by %c127_i32_100 dim 1 : vector<16x128xi32>, i32 -> vector<16x128xi32>
      %335 = arith.maxsi %334, %69 : vector<16x128xi32>
      %336 = arith.minsi %329, %331 : vector<16x128xi32>
      %337 = arith.minsi %333, %335 : vector<16x128xi32>
      %338 = arith.minsi %336, %337 : vector<16x128xi32>
      %339 = arith.maxsi %338, %72 : vector<16x128xi32>
      %340 = arith.minsi %327, %339 : vector<16x128xi32>
      %c1_i32_101 = arith.constant 1 : i32
      %341 = tpu.dynamic_rotate %340 by %c1_i32_101 dim 0 : vector<16x128xi32>, i32 -> vector<16x128xi32>
      %342 = arith.maxsi %341, %54 : vector<16x128xi32>
      %c15_i32_102 = arith.constant 15 : i32
      %343 = tpu.dynamic_rotate %340 by %c15_i32_102 dim 0 : vector<16x128xi32>, i32 -> vector<16x128xi32>
      %344 = arith.maxsi %343, %59 : vector<16x128xi32>
      %c1_i32_103 = arith.constant 1 : i32
      %345 = tpu.dynamic_rotate %340 by %c1_i32_103 dim 1 : vector<16x128xi32>, i32 -> vector<16x128xi32>
      %346 = arith.maxsi %345, %64 : vector<16x128xi32>
      %c127_i32_104 = arith.constant 127 : i32
      %347 = tpu.dynamic_rotate %340 by %c127_i32_104 dim 1 : vector<16x128xi32>, i32 -> vector<16x128xi32>
      %348 = arith.maxsi %347, %69 : vector<16x128xi32>
      %349 = arith.minsi %342, %344 : vector<16x128xi32>
      %350 = arith.minsi %346, %348 : vector<16x128xi32>
      %351 = arith.minsi %349, %350 : vector<16x128xi32>
      %352 = arith.maxsi %351, %72 : vector<16x128xi32>
      %353 = arith.minsi %340, %352 : vector<16x128xi32>
      %c1_i32_105 = arith.constant 1 : i32
      %354 = tpu.dynamic_rotate %353 by %c1_i32_105 dim 0 : vector<16x128xi32>, i32 -> vector<16x128xi32>
      %355 = arith.maxsi %354, %54 : vector<16x128xi32>
      %c15_i32_106 = arith.constant 15 : i32
      %356 = tpu.dynamic_rotate %353 by %c15_i32_106 dim 0 : vector<16x128xi32>, i32 -> vector<16x128xi32>
      %357 = arith.maxsi %356, %59 : vector<16x128xi32>
      %c1_i32_107 = arith.constant 1 : i32
      %358 = tpu.dynamic_rotate %353 by %c1_i32_107 dim 1 : vector<16x128xi32>, i32 -> vector<16x128xi32>
      %359 = arith.maxsi %358, %64 : vector<16x128xi32>
      %c127_i32_108 = arith.constant 127 : i32
      %360 = tpu.dynamic_rotate %353 by %c127_i32_108 dim 1 : vector<16x128xi32>, i32 -> vector<16x128xi32>
      %361 = arith.maxsi %360, %69 : vector<16x128xi32>
      %362 = arith.minsi %355, %357 : vector<16x128xi32>
      %363 = arith.minsi %359, %361 : vector<16x128xi32>
      %364 = arith.minsi %362, %363 : vector<16x128xi32>
      %365 = arith.maxsi %364, %72 : vector<16x128xi32>
      %366 = arith.minsi %353, %365 : vector<16x128xi32>
      %c1_i32_109 = arith.constant 1 : i32
      %367 = tpu.dynamic_rotate %366 by %c1_i32_109 dim 0 : vector<16x128xi32>, i32 -> vector<16x128xi32>
      %368 = arith.maxsi %367, %54 : vector<16x128xi32>
      %c15_i32_110 = arith.constant 15 : i32
      %369 = tpu.dynamic_rotate %366 by %c15_i32_110 dim 0 : vector<16x128xi32>, i32 -> vector<16x128xi32>
      %370 = arith.maxsi %369, %59 : vector<16x128xi32>
      %c1_i32_111 = arith.constant 1 : i32
      %371 = tpu.dynamic_rotate %366 by %c1_i32_111 dim 1 : vector<16x128xi32>, i32 -> vector<16x128xi32>
      %372 = arith.maxsi %371, %64 : vector<16x128xi32>
      %c127_i32_112 = arith.constant 127 : i32
      %373 = tpu.dynamic_rotate %366 by %c127_i32_112 dim 1 : vector<16x128xi32>, i32 -> vector<16x128xi32>
      %374 = arith.maxsi %373, %69 : vector<16x128xi32>
      %375 = arith.minsi %368, %370 : vector<16x128xi32>
      %376 = arith.minsi %372, %374 : vector<16x128xi32>
      %377 = arith.minsi %375, %376 : vector<16x128xi32>
      %378 = arith.maxsi %377, %72 : vector<16x128xi32>
      %379 = arith.minsi %366, %378 : vector<16x128xi32>
      %380 = arith.subi %arg5, %379 : vector<16x128xi32>
      %381 = vector.shape_cast %380 : vector<16x128xi32> to vector<1x16x128xi32>
      %cst_113 = arith.constant dense<-2147483648> : vector<1xi32>
      %382 = vector.multi_reduction <maxsi>, %381, %cst_113 [1, 2] : vector<1x16x128xi32> to vector<1xi32>
      %383 = vector.shape_cast %382 : vector<1xi32> to vector<1x1x1xi32>
      %384 = vector.extract %383[0, 0, 0] : i32 from vector<1x1x1xi32>
      %c0_i32_114 = arith.constant 0 : i32
      %385 = arith.cmpi sgt, %384, %c0_i32_114 : i32
      %c16_i32_115 = arith.constant 16 : i32
      %386 = arith.addi %arg4, %c16_i32_115 : i32
      scf.yield %386, %379, %385 : i32, vector<16x128xi32>, i1
    }
    %81 = arith.cmpi eq, %80#1, %7 : vector<16x128xi32>
    %82 = arith.andi %2, %81 : vector<16x128xi1>
    %83 = arith.extui %82 : vector<16x128xi1> to vector<16x128xi32>
    %84 = arith.sitofp %83 : vector<16x128xi32> to vector<16x128xf32>
    %85 = arith.truncf %84 : vector<16x128xf32> to vector<16x128xbf16>
    %86 = tpu.iota {dimensions = array<i32: 0>} : vector<8x1xi32>
    %87 = tpu.iota {dimensions = array<i32: 1>} : vector<8x1xi32>
    %c8_i32 = arith.constant 8 : i32
    %88 = vector.broadcast %c8_i32 : i32 to vector<8x1xi32>
    %89 = arith.muli %87, %88 : vector<8x1xi32>
    %90 = arith.cmpi sge, %86, %89 : vector<8x1xi32>
    %c8_i32_26 = arith.constant 8 : i32
    %91 = vector.broadcast %c8_i32_26 : i32 to vector<8x1xi32>
    %92 = arith.muli %87, %91 : vector<8x1xi32>
    %c8_i32_27 = arith.constant 8 : i32
    %93 = vector.broadcast %c8_i32_27 : i32 to vector<8x1xi32>
    %94 = arith.addi %92, %93 : vector<8x1xi32>
    %95 = arith.cmpi slt, %86, %94 : vector<8x1xi32>
    %96 = arith.andi %90, %95 : vector<8x1xi1>
    %c0_i32_28 = arith.constant 0 : i32
    %97 = vector.broadcast %c0_i32_28 : i32 to vector<8x1xi32>
    %98 = arith.select %96, %87, %97 : vector<8x1xi1>, vector<8x1xi32>
    %cst_29 = arith.constant dense<0> : vector<8xi32>
    %99 = vector.multi_reduction <add>, %98, %cst_29 [1] : vector<8x1xi32> to vector<8xi32>
    %100 = vector.shape_cast %99 : vector<8xi32> to vector<8x1xi32>
    %101 = tpu.iota {dimensions = array<i32: 0>} : vector<8x1xi32>
    %c8_i32_30 = arith.constant 8 : i32
    %102 = vector.broadcast %c8_i32_30 : i32 to vector<8x1xi32>
    %103 = arith.muli %100, %102 : vector<8x1xi32>
    %104 = arith.subi %101, %103 : vector<8x1xi32>
    %105 = tpu.iota {dimensions = array<i32: 1>} : vector<8x16xi32>
    %c16_i32_31 = arith.constant 16 : i32
    %106 = vector.broadcast %c16_i32_31 : i32 to vector<8x1xi32>
    %107 = arith.muli %100, %106 : vector<8x1xi32>
    %108 = vector.broadcast %107 : vector<8x1xi32> to vector<8x16xi32>
    %109 = arith.cmpi sge, %105, %108 : vector<8x16xi32>
    %c16_i32_32 = arith.constant 16 : i32
    %110 = vector.broadcast %c16_i32_32 : i32 to vector<8x1xi32>
    %111 = arith.muli %100, %110 : vector<8x1xi32>
    %c16_i32_33 = arith.constant 16 : i32
    %112 = vector.broadcast %c16_i32_33 : i32 to vector<8x1xi32>
    %113 = arith.addi %111, %112 : vector<8x1xi32>
    %114 = vector.broadcast %113 : vector<8x1xi32> to vector<8x16xi32>
    %115 = arith.cmpi slt, %105, %114 : vector<8x16xi32>
    %116 = arith.andi %109, %115 : vector<8x16xi1>
    %117 = arith.extui %116 : vector<8x16xi1> to vector<8x16xi32>
    %118 = arith.sitofp %117 : vector<8x16xi32> to vector<8x16xf32>
    %119 = arith.truncf %118 : vector<8x16xf32> to vector<8x16xbf16>
    %cst_34 = arith.constant dense<0.000000e+00> : vector<8x128xf32>
    %120 = tpu.matmul %119, %85, %cst_34 {dimension_numbers = #tpu.dot_dimension_numbers<[1], [0], [0], [1], [0, 0, 1, 1], [], []>} : vector<8x16xbf16>, vector<16x128xbf16>, vector<8x128xf32> -> vector<8x128xf32>
    %121 = tpu.iota {dimensions = array<i32: 1>} : vector<8x128xi32>
    %c16_i32_35 = arith.constant 16 : i32
    %122 = vector.broadcast %c16_i32_35 : i32 to vector<8x1xi32>
    %123 = arith.muli %104, %122 : vector<8x1xi32>
    %124 = vector.broadcast %123 : vector<8x1xi32> to vector<8x128xi32>
    %125 = arith.cmpi sge, %121, %124 : vector<8x128xi32>
    %c16_i32_36 = arith.constant 16 : i32
    %126 = vector.broadcast %c16_i32_36 : i32 to vector<8x1xi32>
    %127 = arith.muli %104, %126 : vector<8x1xi32>
    %c16_i32_37 = arith.constant 16 : i32
    %128 = vector.broadcast %c16_i32_37 : i32 to vector<8x1xi32>
    %129 = arith.addi %127, %128 : vector<8x1xi32>
    %130 = vector.broadcast %129 : vector<8x1xi32> to vector<8x128xi32>
    %131 = arith.cmpi slt, %121, %130 : vector<8x128xi32>
    %132 = arith.andi %125, %131 : vector<8x128xi1>
    %133 = arith.extui %132 : vector<8x128xi1> to vector<8x128xi32>
    %134 = arith.sitofp %133 : vector<8x128xi32> to vector<8x128xf32>
    %135 = arith.mulf %120, %134 : vector<8x128xf32>
    %cst_38 = arith.constant dense<0.000000e+00> : vector<8xf32>
    %136 = vector.multi_reduction <add>, %135, %cst_38 [1] : vector<8x128xf32> to vector<8xf32>
    %137 = vector.shape_cast %136 : vector<8xf32> to vector<8x1xf32>
    %c0_39 = arith.constant 0 : index
    %c0_40 = arith.constant 0 : index
    %138 = vector.load %arg2[%c0_39, %c0_40] : memref<8x128xf32, #tpu.memory_space<vmem>>, vector<8x128xf32>
    %139 = tpu.iota {dimensions = array<i32: 1>} : vector<8x128xi32>
    %140 = arith.sitofp %139 : vector<8x128xi32> to vector<8x128xf32>
    %cst_41 = arith.constant 0.000000e+00 : f32
    %141 = vector.broadcast %cst_41 : f32 to vector<8x128xf32>
    %142 = arith.cmpf ogt, %138, %141 : vector<8x128xf32>
    %143 = arith.extui %142 : vector<8x128xi1> to vector<8x128xi32>
    %144 = arith.sitofp %143 : vector<8x128xi32> to vector<8x128xf32>
    %cst_42 = arith.constant dense<0.000000e+00> : vector<8xf32>
    %145 = vector.multi_reduction <add>, %144, %cst_42 [1] : vector<8x128xf32> to vector<8xf32>
    %146 = vector.shape_cast %145 : vector<8xf32> to vector<8x1xf32>
    %147 = vector.broadcast %137 : vector<8x1xf32> to vector<8x128xf32>
    %148 = arith.cmpf olt, %140, %147 : vector<8x128xf32>
    %149 = arith.extui %148 : vector<8x128xi1> to vector<8x128xi32>
    %150 = arith.sitofp %149 : vector<8x128xi32> to vector<8x128xf32>
    %151 = vector.broadcast %146 : vector<8x1xf32> to vector<8x128xf32>
    %152 = arith.cmpf olt, %140, %151 : vector<8x128xf32>
    %153 = arith.extui %152 : vector<8x128xi1> to vector<8x128xi32>
    %154 = arith.sitofp %153 : vector<8x128xi32> to vector<8x128xf32>
    %155 = arith.subf %138, %150 : vector<8x128xf32>
    %156 = math.absf %155 : vector<8x128xf32>
    %157 = arith.mulf %156, %154 : vector<8x128xf32>
    %cst_43 = arith.constant dense<0.000000e+00> : vector<8xf32>
    %158 = vector.multi_reduction <add>, %157, %cst_43 [1] : vector<8x128xf32> to vector<8xf32>
    %159 = vector.shape_cast %158 : vector<8xf32> to vector<8x1xf32>
    %cst_44 = arith.constant 0.000000e+00 : f32
    %160 = vector.broadcast %cst_44 : f32 to vector<8x1xf32>
    %161 = arith.cmpf ogt, %137, %160 : vector<8x1xf32>
    %cst_45 = arith.constant 0.000000e+00 : f32
    %162 = vector.broadcast %cst_45 : f32 to vector<8x1xf32>
    %163 = arith.select %161, %159, %162 : vector<8x1xi1>, vector<8x1xf32>
    %164 = vector.shape_cast %163 : vector<8x1xf32> to vector<1x8x1xf32>
    %cst_46 = arith.constant dense<0.000000e+00> : vector<1xf32>
    %165 = vector.multi_reduction <add>, %164, %cst_46 [1, 2] : vector<1x8x1xf32> to vector<1xf32>
    %166 = vector.shape_cast %165 : vector<1xf32> to vector<1x1x1xf32>
    %167 = vector.extract %166[0, 0, 0] : f32 from vector<1x1x1xf32>
    %cst_47 = arith.constant 0.000000e+00 : f32
    %168 = vector.broadcast %cst_47 : f32 to vector<1x8x128xf32>
    %169 = vector.broadcast %167 : f32 to vector<1x8x128xf32>
    %170 = arith.addf %169, %168 : vector<1x8x128xf32>
    %c0_48 = arith.constant 0 : index
    %c0_49 = arith.constant 0 : index
    %c0_50 = arith.constant 0 : index
    %171 = vector.load %arg3[%c0_48, %c0_49, %c0_50] : memref<1x8x128xf32, #tpu.memory_space<vmem>>, vector<1x8x128xf32>
    tpu.vector_store %arg3[%c0_48, %c0_49, %c0_50], %170 {strides = array<i32>} : memref<1x8x128xf32, #tpu.memory_space<vmem>>, vector<1x8x128xf32>,
    return
  }
  func.func @transform_0(%arg0: i32) -> (i32, i32) {
    %c0_i32 = arith.constant 0 : i32
    %c0_i32_0 = arith.constant 0 : i32
    return %arg0, %c0_i32 : i32, i32
  }
  func.func @transform_1(%arg0: i32) -> (i32, i32) {
    %c0_i32 = arith.constant 0 : i32
    %c0_i32_0 = arith.constant 0 : i32
    return %arg0, %c0_i32 : i32, i32
  }
  func.func @transform_2(%arg0: i32) -> (i32, i32, i32) {
    %c0_i32 = arith.constant 0 : i32
    %c0_i32_0 = arith.constant 0 : i32
    %c0_i32_1 = arith.constant 0 : i32
    return %arg0, %c0_i32, %c0_i32_0 : i32, i32, i32
  }
}

</mosaic_0001>

<bundles_post_ra>
// kernel: neg.3
= control target key start
LH: loop header
LB: loop body
LE: loop exit
PB: predicated region body
PF: predicated region fallthrough
CT: control target
= control target key end

     0   :  { %s72_s0 = inlined_call_operand.vmem [shape: f32[16,256], index: 0, kind: input, shape index: {}]   ;;  %s73_s1 = inlined_call_operand.vmem [shape: f32[16,256], index: 1, kind: output, shape index: {}]  }
   0x1   :  { %v2_v0 = vld [vmem:[%s72_s0] sm:$0xff]  ;;  %v32_v1 = vld [vmem:[%s72_s0 + $0x10] sm:$0xff]  ;;  %v34_v2 = vld [vmem:[%s72_s0 + $0x8] sm:$0xff] }
   0x2   :  { %v5_v3 = vxor.u32 2147483648, %v2_v0  ;;  %v12_v4 = vxor.u32 2147483648, %v32_v1  ;;  %v20_v5 = vxor.u32 2147483648, %v34_v2  ;;  %v36_v6 = vld [vmem:[%s72_s0 + $0x18] sm:$0xff] }
   0x3   :  { %v28_v7 = vxor.u32 2147483648, %v36_v6 }
   0x4   :  { %7 = vst [vmem:[%s73_s1] sm:$0xff] %v5_v3  ;;  %33 = vst [vmem:[%s73_s1 + $0x10] sm:$0xff] %v12_v4 }
   0x5   :  { %35 = vst [vmem:[%s73_s1 + $0x8] sm:$0xff] %v20_v5  ;;  %37 = vst [vmem:[%s73_s1 + $0x18] sm:$0xff] %v28_v7 }

// kernel: _topo3d_loss.1
= control target key start
LH: loop header
LB: loop body
LE: loop exit
PB: predicated region body
PF: predicated region fallthrough
CT: control target
= control target key end

     0   :  { %s1478_s9 = smov 0   ;;  %s2147_s0 = inlined_call_operand.vmem [shape: f32[32,128], index: 0, kind: input, shape index: {}]   ;;  %s2148_s1 = inlined_call_operand.vmem [shape: f32[16,128], index: 1, kind: input, shape index: {}]   ;;  %s2149_s2 = inlined_call_operand.vmem [shape: f32[2,8,128], index: 2, kind: output, shape index: {}]  }
   0x1 LB: > { %s1484_s10 = sadd.s32 4294967295, %s1434_s9   ;;  %p1317_p0 = scmp.ge.s32.totalorder %s1434_s9, 1  ;;  %s1434_s9 = sphi %s1478_s9, %s12_s9  }
   0x2   : > { %p122_p1 = scmp.lt.s32.totalorder %s1434_s9, 3 }
   0x4   : > { %p123_p2 = pnand %p1317_p0, %p122_p1 }
   0x5   : > { %s1318_s11 = sshll.u32 (!%p123_p2), %s1484_s10, 1  ;;  %v166_v0 = vlaneseq (!%p123_p2)  ;;  %v1456_v1 = vmov (!%p123_p2), 0   ;;  %v1457_v16 = vmov (!%p123_p2), 2055   ;;  %p153_p4 = scmp.lt.s32.totalorder (!%p123_p2), %s1484_s10, 1 }
   0x6   : > { %126 = sbr.rel (%p123_p2) target bundleno = 3528 (0xdc8), region = 28  ;;  %p148_p3 = scmp.lt.s32.totalorder (!%p123_p2), %s1318_s11, 3  ;;  %1405 = vset.pattern.permute.xlu1 (!%p123_p2), %v1456_v1  ;;  %1404 = vset.pattern.permute.xlu0 (!%p123_p2), %v1456_v1 }
   0x7   : > { %v1491_v2 = vshrl.u32 (!%p123_p2), %v166_v0, 7  ;;  %v1493_v3 = vand.u32 (!%p123_p2), 127, %v166_v0 }
   0x9   : > { %v168_v4 = vadd.s32 (!%p123_p2), 8, %v1491_v2  ;;  %v171_v5 = vmul.u32 (!%p123_p2), 128, %v1491_v2  ;;  %v189_v6 = vmul.u32 (!%p123_p2), 16, %v1491_v2 }
   0xa   : > { %v175_v7 = vmul.u32 (!%p123_p2), 16, %v1493_v3 }
   0xb   : > { %v172_v8 = vmul.u32 (!%p123_p2), 128, %v168_v4  ;;  %v1503_v9 = vadd.s32 (!%p123_p2), %v171_v5, %v1493_v3  ;;  %vm190_vm0 = vcmp.ge.s32.totalorder (!%p123_p2), %v1493_v3, %v189_v6  ;;  %v191_v10 = vadd.s32 (!%p123_p2), 16, %v189_v6 }
   0xc   : > { %vm177_vm1 = vcmp.ge.s32.totalorder (!%p123_p2), %v168_v4, %v175_v7  ;;  %v178_v13 = vadd.s32 (!%p123_p2), 16, %v175_v7  ;;  %vm176_vm8 = vcmp.ge.s32.totalorder (!%p123_p2), %v1491_v2, %v175_v7 }
   0xd   : > { %s2157_s11 = smov (!%p148_p3, %s1318_s11), 3  ;;  %v1512_v14 = vadd.s32 %v172_v8, %v1493_v3  ;;  %vm192_vm3 = vcmp.lt.s32.totalorder %v1493_v3, %v191_v10  ;;  %s2159_s10 = smov (!%p153_p4, %s1484_s10), 1 }
   0xe   : > { %s1319_s12 = sshll.u32 %s2157_s11, 3  ;;  %vm193_vm4 = vmand %vm190_vm0, %vm192_vm3  ;;  %vm180_vm6 = vcmp.lt.s32.totalorder %v168_v4, %v178_v13  ;;  %vm179_vm9 = vcmp.lt.s32.totalorder %v1491_v2, %v178_v13  ;;  %s1320_s16 = sshll.u32 %s2159_s10, 3 }
   0xf   : > { %s151_s15 = scalar_lea.vmem %s2147_s0, %s1319_s12  ;;  %v194_v18 = vsel %vm193_vm4, %v1491_v2, 0  ;;  %vm182_vm7 = vmand %vm177_vm1, %vm180_vm6  ;;  %s1549_s19 = scalar_lea.vmem %s2148_s1, %s1320_s16 }
  0x10   : > { %v1506_v11 = vld [vmem:[%s151_s15] sm:$0xff]  ;;  %v1508_v12 = vld [vmem:[%s151_s15 + $0x8] sm:$0xff]  ;;  %v195_v22 = vrot.slane %v194_v18, 4  ;;  %v184_v23 = vsel %vm182_vm7, %v1493_v3, 0  ;;  %vm181_vm10 = vmand %vm176_vm8, %vm179_vm9  ;;  %s1554_s22 = scalar_lea.vmem %s2149_s2, %s1320_s16 }
  0x11   : > { %vm165_vm2 = vcmp.gt.f32.partialorder %v1508_v12, 0.0  ;;  %v225_v15 = vmax.f32 %v1506_v11, %v1508_v12  ;;  %vm164_vm5 = vcmp.gt.f32.partialorder %v1506_v11, 0.0  ;;  %v186_v24 = vmul.u32 16, %v184_v23 }
  0x12   : > { %v1519_v17 = vsel %vm165_vm2, 0, %v1457_v16  ;;  %v224_v19 = vsel %vm165_vm2, %v1512_v14, 2055   ;;  %v1528_v20 = vsel %vm164_vm5, 0, %v1457_v16  ;;  %v223_v21 = vsel %vm164_vm5, %v1503_v9, 2055  }
  0x13   : > { %226 = vmax.xlane.f32.xlu0 %v225_v15  ;;  %v196_v25 = vadd.s32 %v195_v22, %v194_v18  ;;  %v188_v26 = vsub.s32 %v168_v4, %v186_v24  ;;  %v183_v31 = vsel %vm181_vm10, %v1493_v3, 0  ;;  %v2150_v51 = vmov %v224_v19 }
  0x14   : > { %v185_v33 = vmul.u32 16, %v183_v31  ;;  %v2151_v52 = vmov %v223_v21 }
  0x15   : > { %v197_v27 = vrot.slane %v196_v25, 2  ;;  %207 = vperm.xlu1 %1405, %v188_v26  }
  0x16   : > { %v187_v37 = vsub.s32 %v1491_v2, %v185_v33 }
  0x17   : > { %v198_v28 = vadd.s32 %v197_v27, %v196_v25 }
  0x19   : > { %v199_v29 = vrot.slane %v198_v28, 1 }
  0x1b   : > { %v200_v30 = vadd.s32 %v199_v29, %v198_v28 }
  0x1d   : > { %v201_v32 = vmul.u32 16, %v200_v30 }
  0x1f   : > { %v202_v34 = vsub.s32 %v1493_v3, %v201_v32 }
  0x21   : > { %vm217_vm11 = vcmp.ge.s32.totalorder %v202_v34, 1  ;;  %vm219_vm12 = vcmp.le.s32.totalorder %v202_v34, 14 }
  0x22   : > { %v1539_v35 = vsel %vm217_vm11, 0, %v1457_v16  ;;  %v1541_v36 = vsel %vm219_vm12, 0, %v1457_v16 }
  0x29   : > { %204 = vperm.xlu0 %1404, %v187_v37  }
  0x94   : > { %v208_v38 = vpop.permute.xlu1 %207 }
  0x95   : > { %vm210_vm13 = vcmp.ge.s32.totalorder %v208_v38, 1  ;;  %vm214_vm14 = vcmp.le.s32.totalorder %v208_v38, 14 }
  0x96   : > { %v1556_v39 = vsel %vm210_vm13, 0, %v1457_v16  ;;  %v1558_v40 = vsel %vm214_vm14, 0, %v1457_v16 }
  0xa0   : > { %v227_v41 = vpop.xlane.xlu0 %226 }
  0xa1   : > { %v228_v42 = vrot.slane %v227_v41, 4 }
  0xa3   : > { %v229_v43 = vmax.f32 %v227_v41, %v228_v42 }
  0xa5   : > { %v230_v44 = vrot.slane %v229_v43, 2 }
  0xa7   : > { %v231_v45 = vmax.f32 %v229_v43, %v230_v44 }
  0xa8   : > { %v205_v46 = vpop.permute.xlu0 %204 }
  0xa9   : > { %v232_v47 = vrot.slane %v231_v45, 1  ;;  %vm209_vm15 = vcmp.ge.s32.totalorder %v205_v46, 1  ;;  %vm213_vm0 = vcmp.le.s32.totalorder %v205_v46, 14 }
  0xaa   : > { %v1560_v48 = vsel %vm209_vm15, 0, %v1457_v16  ;;  %v1562_v49 = vsel %vm213_vm0, 0, %v1457_v16 }
  0xab   : > { %v233_v50 = vmax.f32 %v231_v45, %v232_v47 }
  0xad   : > { %1343 = vpush %v233_v50 }
  0xde   : > { %s1344_s23 = spop %1343 }
  0xdf   : > { %p235_p5 = scmp.gt.f32.partialorder %s1344_s23, 0.0 }
  0xe0   : > { %s1572_s24 = smov (%p235_p5), 0  }
  0xe1   : > { %1280 = sbr.rel (!%p235_p5) target bundleno = 2668 (0xa6c), region = 62 }
  0xe8 LB: >> { %s1458_s25 = smov 127   ;;  %s1459_s26 = smov 1   ;;  %v246_v53 = vrot.slane %v1442_v21, 7  ;;  %v247_v54 = vrot.slane %v1438_v19, 7  ;;  %v255_v55 = vrot.slane %v1442_v21, 1  ;;  %v256_v56 = vrot.slane %v1438_v19, 1  ;;  %s1446_s24 = sphi %s1572_s24, %s1109_s24   ;;  %v1442_v21 = vphi %v223_v21, %v2153_v21   ;;  %v1438_v19 = vphi %v224_v19, %v2152_v19  }
  0xe9   : >> { %272 = vrot.lane.b32.xlu1 %v1442_v21, %s1458_s25  ;;  %264 = vrot.lane.b32.xlu0 %v1442_v21, %s1459_s26  ;;  %vm248_vm1 = vcmp.lt.s32.totalorder %v1491_v2, 1  ;;  %vm257_vm3 = vcmp.lt.s32.totalorder %v1491_v2, 7  ;;  %s1109_s24 = sadd.s32 16, %s1446_s24  }
  0xea   : >> { %v250_v57 = vsel %vm248_vm1, %v247_v54, %v246_v53  ;;  %v258_v58 = vsel %vm257_vm3, %v255_v55, %v256_v56  ;;  %v249_v59 = vsel %vm248_vm1, %v246_v53, %v247_v54  ;;  %v259_v60 = vsel %vm257_vm3, %v256_v56, %v255_v55  ;;  %p241_p7 = scmp.lt.s32.totalorder %s1109_s24, 256 }
  0xeb   : >> { %vm251_vm4 = vcmp.gt.s32.totalorder %v250_v57, %v1560_v48  ;;  %vm260_vm6 = vcmp.gt.s32.totalorder %v258_v58, %v1562_v49  ;;  %vm253_vm7 = vcmp.gt.s32.totalorder %v249_v59, %v1556_v39  ;;  %vm262_vm8 = vcmp.gt.s32.totalorder %v259_v60, %v1558_v40 }
  0xec   : >> { %v252_v61 = vsel %vm251_vm4, %v250_v57, %v1560_v48  ;;  %v261_v62 = vsel %vm260_vm6, %v258_v58, %v1562_v49  ;;  %v254_v4 = vsel %vm253_vm7, %v249_v59, %v1556_v39  ;;  %v263_v5 = vsel %vm262_vm8, %v259_v60, %v1558_v40 }
  0xed   : >> { %274 = vrot.lane.b32.xlu1 %v1438_v19, %s1458_s25  ;;  %266 = vrot.lane.b32.xlu0 %v1438_v19, %s1459_s26  ;;  %vm280_vm9 = vcmp.lt.s32.totalorder %v252_v61, %v261_v62  ;;  %vm282_vm13 = vcmp.lt.s32.totalorder %v254_v4, %v263_v5 }
  0xee   : >> { %v281_v8 = vsel %vm280_vm9, %v252_v61, %v261_v62  ;;  %v283_v23 = vsel %vm282_vm13, %v254_v4, %v263_v5 }
 0x15b   : >> { %v273_v63 = vpop.permute.xlu1 %272  ;;  %v265_v0 = vpop.permute.xlu0 %264 }
 0x15c   : >> { %vm276_vm10 = vcmp.gt.s32.totalorder %v273_v63, %v1541_v36  ;;  %vm268_vm11 = vcmp.gt.s32.totalorder %v265_v0, %v1539_v35 }
 0x15d   : >> { %v277_v6 = vsel %vm276_vm10, %v273_v63, %v1541_v36  ;;  %v269_v7 = vsel %vm268_vm11, %v265_v0, %v1539_v35 }
 0x15e   : >> { %vm284_vm12 = vcmp.lt.s32.totalorder %v269_v7, %v277_v6 }
 0x15f   : >> { %v285_v10 = vsel %vm284_vm12, %v269_v7, %v277_v6  ;;  %v275_v13 = vpop.permute.xlu1 %274  ;;  %v267_v15 = vpop.permute.xlu0 %266 }
 0x160   : >> { %vm288_vm14 = vcmp.lt.s32.totalorder %v281_v8, %v285_v10  ;;  %vm278_vm15 = vcmp.gt.s32.totalorder %v275_v13, %v1541_v36  ;;  %vm270_vm0 = vcmp.gt.s32.totalorder %v267_v15, %v1539_v35 }
 0x161   : >> { %v289_v16 = vsel %vm288_vm14, %v281_v8, %v285_v10  ;;  %v279_v18 = vsel %vm278_vm15, %v275_v13, %v1541_v36  ;;  %v271_v22 = vsel %vm270_vm0, %v267_v15, %v1539_v35 }
 0x162   : >> { %vm292_vm4 = vcmp.gt.s32.totalorder %v289_v16, %v1528_v20  ;;  %vm286_vm6 = vcmp.lt.s32.totalorder %v271_v22, %v279_v18 }
 0x163   : >> { %v293_v24 = vsel %vm292_vm4, %v289_v16, %v1528_v20  ;;  %v287_v25 = vsel %vm286_vm6, %v271_v22, %v279_v18 }
 0x164   : >> { %vm296_vm7 = vcmp.lt.s32.totalorder %v1442_v21, %v293_v24  ;;  %vm290_vm8 = vcmp.lt.s32.totalorder %v283_v23, %v287_v25 }
 0x165   : >> { %v291_v26 = vsel %vm290_vm8, %v283_v23, %v287_v25  ;;  %v297_v27 = vsel %vm296_vm7, %v1442_v21, %v293_v24 }
 0x166   : >> { %vm294_vm9 = vcmp.gt.s32.totalorder %v291_v26, %v1519_v17  ;;  %316 = vrot.lane.b32.xlu0 %v297_v27, %s1459_s26  ;;  %v300_v32 = vrot.slane %v297_v27, 7  ;;  %v308_v33 = vrot.slane %v297_v27, 1 }
 0x167   : >> { %v295_v28 = vsel %vm294_vm9, %v291_v26, %v1519_v17 }
 0x168   : >> { %vm298_vm10 = vcmp.lt.s32.totalorder %v1438_v19, %v295_v28 }
 0x169   : >> { %v299_v29 = vsel %vm298_vm10, %v1438_v19, %v295_v28 }
 0x16a   : >> { %324 = vrot.lane.b32.xlu0 %v297_v27, %s1458_s25  ;;  %318 = vrot.lane.b32.xlu1 %v299_v29, %s1459_s26  ;;  %v301_v30 = vrot.slane %v299_v29, 7  ;;  %v309_v31 = vrot.slane %v299_v29, 1 }
 0x16c   : >> { %v303_v34 = vsel %vm248_vm1, %v301_v30, %v300_v32  ;;  %v310_v37 = vsel %vm257_vm3, %v308_v33, %v309_v31  ;;  %v302_v41 = vsel %vm248_vm1, %v300_v32, %v301_v30  ;;  %v311_v42 = vsel %vm257_vm3, %v309_v31, %v308_v33 }
 0x16d   : >> { %vm304_vm11 = vcmp.gt.s32.totalorder %v303_v34, %v1560_v48  ;;  %vm312_vm12 = vcmp.gt.s32.totalorder %v310_v37, %v1562_v49  ;;  %vm306_vm14 = vcmp.gt.s32.totalorder %v302_v41, %v1556_v39  ;;  %vm314_vm15 = vcmp.gt.s32.totalorder %v311_v42, %v1558_v40 }
 0x16e   : >> { %326 = vrot.lane.b32.xlu1 %v299_v29, %s1458_s25  ;;  %v305_v43 = vsel %vm304_vm11, %v303_v34, %v1560_v48  ;;  %v313_v44 = vsel %vm312_vm12, %v310_v37, %v1562_v49  ;;  %v307_v51 = vsel %vm306_vm14, %v302_v41, %v1556_v39  ;;  %v315_v52 = vsel %vm314_vm15, %v311_v42, %v1558_v40 }
 0x16f   : >> { %vm332_vm4 = vcmp.lt.s32.totalorder %v305_v43, %v313_v44  ;;  %vm334_vm10 = vcmp.lt.s32.totalorder %v307_v51, %v315_v52 }
 0x170   : >> { %v333_v53 = vsel %vm332_vm4, %v305_v43, %v313_v44  ;;  %v335_v60 = vsel %vm334_vm10, %v307_v51, %v315_v52 }
 0x1d8   : >> { %v317_v38 = vpop.permute.xlu0 %316 }
 0x1d9   : >> { %vm320_vm13 = vcmp.gt.s32.totalorder %v317_v38, %v1539_v35 }
 0x1da   : >> { %v321_v47 = vsel %vm320_vm13, %v317_v38, %v1539_v35 }
 0x1dc   : >> { %v325_v45 = vpop.permute.xlu0 %324  ;;  %v319_v46 = vpop.permute.xlu1 %318 }
 0x1dd   : >> { %vm328_vm0 = vcmp.gt.s32.totalorder %v325_v45, %v1541_v36  ;;  %vm322_vm7 = vcmp.gt.s32.totalorder %v319_v46, %v1539_v35 }
 0x1de   : >> { %v329_v50 = vsel %vm328_vm0, %v325_v45, %v1541_v36  ;;  %v323_v57 = vsel %vm322_vm7, %v319_v46, %v1539_v35 }
 0x1df   : >> { %vm336_vm6 = vcmp.lt.s32.totalorder %v321_v47, %v329_v50 }
 0x1e0   : >> { %v337_v54 = vsel %vm336_vm6, %v321_v47, %v329_v50  ;;  %v327_v55 = vpop.permute.xlu1 %326 }
 0x1e1   : >> { %vm340_vm8 = vcmp.lt.s32.totalorder %v333_v53, %v337_v54  ;;  %vm330_vm9 = vcmp.gt.s32.totalorder %v327_v55, %v1541_v36 }
 0x1e2   : >> { %v341_v56 = vsel %vm340_vm8, %v333_v53, %v337_v54  ;;  %v331_v58 = vsel %vm330_vm9, %v327_v55, %v1541_v36 }
 0x1e3   : >> { %vm344_vm11 = vcmp.gt.s32.totalorder %v341_v56, %v1528_v20  ;;  %vm338_vm12 = vcmp.lt.s32.totalorder %v323_v57, %v331_v58 }
 0x1e4   : >> { %v345_v59 = vsel %vm344_vm11, %v341_v56, %v1528_v20  ;;  %v339_v61 = vsel %vm338_vm12, %v323_v57, %v331_v58 }
 0x1e5   : >> { %vm348_vm13 = vcmp.lt.s32.totalorder %v297_v27, %v345_v59  ;;  %vm342_vm14 = vcmp.lt.s32.totalorder %v335_v60, %v339_v61 }
 0x1e6   : >> { %v343_v62 = vsel %vm342_vm14, %v335_v60, %v339_v61  ;;  %v349_v63 = vsel %vm348_vm13, %v297_v27, %v345_v59 }
 0x1e7   : >> { %vm346_vm15 = vcmp.gt.s32.totalorder %v343_v62, %v1519_v17  ;;  %368 = vrot.lane.b32.xlu0 %v349_v63, %s1459_s26  ;;  %v352_v7 = vrot.slane %v349_v63, 7  ;;  %v360_v8 = vrot.slane %v349_v63, 1 }
 0x1e8   : >> { %v347_v0 = vsel %vm346_vm15, %v343_v62, %v1519_v17 }
 0x1e9   : >> { %vm350_vm0 = vcmp.lt.s32.totalorder %v299_v29, %v347_v0 }
 0x1ea   : >> { %v351_v4 = vsel %vm350_vm0, %v299_v29, %v347_v0 }
 0x1eb   : >> { %376 = vrot.lane.b32.xlu0 %v349_v63, %s1458_s25  ;;  %370 = vrot.lane.b32.xlu1 %v351_v4, %s1459_s26  ;;  %v353_v5 = vrot.slane %v351_v4, 7  ;;  %v361_v6 = vrot.slane %v351_v4, 1 }
 0x1ed   : >> { %v355_v10 = vsel %vm248_vm1, %v353_v5, %v352_v7  ;;  %v362_v13 = vsel %vm257_vm3, %v360_v8, %v361_v6  ;;  %v354_v16 = vsel %vm248_vm1, %v352_v7, %v353_v5  ;;  %v363_v18 = vsel %vm257_vm3, %v361_v6, %v360_v8 }
 0x1ee   : >> { %vm356_vm4 = vcmp.gt.s32.totalorder %v355_v10, %v1560_v48  ;;  %vm364_vm6 = vcmp.gt.s32.totalorder %v362_v13, %v1562_v49  ;;  %vm358_vm8 = vcmp.gt.s32.totalorder %v354_v16, %v1556_v39  ;;  %vm366_vm9 = vcmp.gt.s32.totalorder %v363_v18, %v1558_v40 }
 0x1ef   : >> { %378 = vrot.lane.b32.xlu1 %v351_v4, %s1458_s25  ;;  %v357_v22 = vsel %vm356_vm4, %v355_v10, %v1560_v48  ;;  %v365_v23 = vsel %vm364_vm6, %v362_v13, %v1562_v49  ;;  %v359_v28 = vsel %vm358_vm8, %v354_v16, %v1556_v39  ;;  %v367_v29 = vsel %vm366_vm9, %v363_v18, %v1558_v40 }
 0x1f0   : >> { %vm384_vm11 = vcmp.lt.s32.totalorder %v357_v22, %v365_v23  ;;  %vm386_vm0 = vcmp.lt.s32.totalorder %v359_v28, %v367_v29 }
 0x1f1   : >> { %v385_v30 = vsel %vm384_vm11, %v357_v22, %v365_v23  ;;  %v387_v41 = vsel %vm386_vm0, %v359_v28, %v367_v29 }
 0x259   : >> { %v369_v15 = vpop.permute.xlu0 %368 }
 0x25a   : >> { %vm372_vm7 = vcmp.gt.s32.totalorder %v369_v15, %v1539_v35 }
 0x25b   : >> { %v373_v26 = vsel %vm372_vm7, %v369_v15, %v1539_v35 }
 0x25d   : >> { %v377_v24 = vpop.permute.xlu0 %376  ;;  %v371_v25 = vpop.permute.xlu1 %370 }
 0x25e   : >> { %vm380_vm10 = vcmp.gt.s32.totalorder %v377_v24, %v1541_v36  ;;  %vm374_vm13 = vcmp.gt.s32.totalorder %v371_v25, %v1539_v35 }
 0x25f   : >> { %v381_v27 = vsel %vm380_vm10, %v377_v24, %v1541_v36  ;;  %v375_v34 = vsel %vm374_vm13, %v371_v25, %v1539_v35 }
 0x260   : >> { %vm388_vm12 = vcmp.lt.s32.totalorder %v373_v26, %v381_v27 }
 0x261   : >> { %v389_v31 = vsel %vm388_vm12, %v373_v26, %v381_v27  ;;  %v379_v32 = vpop.permute.xlu1 %378 }
 0x262   : >> { %vm392_vm14 = vcmp.lt.s32.totalorder %v385_v30, %v389_v31  ;;  %vm382_vm15 = vcmp.gt.s32.totalorder %v379_v32, %v1541_v36 }
 0x263   : >> { %v393_v33 = vsel %vm392_vm14, %v385_v30, %v389_v31  ;;  %v383_v37 = vsel %vm382_vm15, %v379_v32, %v1541_v36 }
 0x264   : >> { %vm396_vm4 = vcmp.gt.s32.totalorder %v393_v33, %v1528_v20  ;;  %vm390_vm6 = vcmp.lt.s32.totalorder %v375_v34, %v383_v37 }
 0x265   : >> { %v397_v38 = vsel %vm396_vm4, %v393_v33, %v1528_v20  ;;  %v391_v42 = vsel %vm390_vm6, %v375_v34, %v383_v37 }
 0x266   : >> { %vm400_vm7 = vcmp.lt.s32.totalorder %v349_v63, %v397_v38  ;;  %vm394_vm8 = vcmp.lt.s32.totalorder %v387_v41, %v391_v42 }
 0x267   : >> { %v395_v43 = vsel %vm394_vm8, %v387_v41, %v391_v42  ;;  %v401_v44 = vsel %vm400_vm7, %v349_v63, %v397_v38 }
 0x268   : >> { %vm398_vm9 = vcmp.gt.s32.totalorder %v395_v43, %v1519_v17  ;;  %420 = vrot.lane.b32.xlu0 %v401_v44, %s1459_s26  ;;  %v404_v51 = vrot.slane %v401_v44, 7  ;;  %v412_v52 = vrot.slane %v401_v44, 1 }
 0x269   : >> { %v399_v45 = vsel %vm398_vm9, %v395_v43, %v1519_v17 }
 0x26a   : >> { %vm402_vm10 = vcmp.lt.s32.totalorder %v351_v4, %v399_v45 }
 0x26b   : >> { %v403_v46 = vsel %vm402_vm10, %v351_v4, %v399_v45 }
 0x26c   : >> { %428 = vrot.lane.b32.xlu0 %v401_v44, %s1458_s25  ;;  %422 = vrot.lane.b32.xlu1 %v403_v46, %s1459_s26  ;;  %v405_v47 = vrot.slane %v403_v46, 7  ;;  %v413_v50 = vrot.slane %v403_v46, 1 }
 0x26e   : >> { %v407_v53 = vsel %vm248_vm1, %v405_v47, %v404_v51  ;;  %v414_v54 = vsel %vm257_vm3, %v412_v52, %v413_v50  ;;  %v406_v56 = vsel %vm248_vm1, %v404_v51, %v405_v47  ;;  %v415_v57 = vsel %vm257_vm3, %v413_v50, %v412_v52 }
 0x26f   : >> { %vm408_vm11 = vcmp.gt.s32.totalorder %v407_v53, %v1560_v48  ;;  %vm416_vm12 = vcmp.gt.s32.totalorder %v414_v54, %v1562_v49  ;;  %vm410_vm14 = vcmp.gt.s32.totalorder %v406_v56, %v1556_v39  ;;  %vm418_vm15 = vcmp.gt.s32.totalorder %v415_v57, %v1558_v40 }
 0x270   : >> { %430 = vrot.lane.b32.xlu1 %v403_v46, %s1458_s25  ;;  %v409_v58 = vsel %vm408_vm11, %v407_v53, %v1560_v48  ;;  %v417_v59 = vsel %vm416_vm12, %v414_v54, %v1562_v49  ;;  %v411_v0 = vsel %vm410_vm14, %v406_v56, %v1556_v39  ;;  %v419_v4 = vsel %vm418_vm15, %v415_v57, %v1558_v40 }
 0x271   : >> { %vm436_vm4 = vcmp.lt.s32.totalorder %v409_v58, %v417_v59  ;;  %vm438_vm10 = vcmp.lt.s32.totalorder %v411_v0, %v419_v4 }
 0x272   : >> { %v437_v5 = vsel %vm436_vm4, %v409_v58, %v417_v59  ;;  %v439_v16 = vsel %vm438_vm10, %v411_v0, %v419_v4 }
 0x2da   : >> { %v421_v55 = vpop.permute.xlu0 %420 }
 0x2db   : >> { %vm424_vm13 = vcmp.gt.s32.totalorder %v421_v55, %v1539_v35 }
 0x2dc   : >> { %v425_v62 = vsel %vm424_vm13, %v421_v55, %v1539_v35 }
 0x2de   : >> { %v429_v60 = vpop.permute.xlu0 %428  ;;  %v423_v61 = vpop.permute.xlu1 %422 }
 0x2df   : >> { %vm432_vm0 = vcmp.gt.s32.totalorder %v429_v60, %v1541_v36  ;;  %vm426_vm7 = vcmp.gt.s32.totalorder %v423_v61, %v1539_v35 }
 0x2e0   : >> { %v433_v63 = vsel %vm432_vm0, %v429_v60, %v1541_v36  ;;  %v427_v10 = vsel %vm426_vm7, %v423_v61, %v1539_v35 }
 0x2e1   : >> { %vm440_vm6 = vcmp.lt.s32.totalorder %v425_v62, %v433_v63 }
 0x2e2   : >> { %v441_v6 = vsel %vm440_vm6, %v425_v62, %v433_v63  ;;  %v431_v7 = vpop.permute.xlu1 %430 }
 0x2e3   : >> { %vm444_vm8 = vcmp.lt.s32.totalorder %v437_v5, %v441_v6  ;;  %vm434_vm9 = vcmp.gt.s32.totalorder %v431_v7, %v1541_v36 }
 0x2e4   : >> { %v445_v8 = vsel %vm444_vm8, %v437_v5, %v441_v6  ;;  %v435_v13 = vsel %vm434_vm9, %v431_v7, %v1541_v36 }
 0x2e5   : >> { %vm448_vm11 = vcmp.gt.s32.totalorder %v445_v8, %v1528_v20  ;;  %vm442_vm12 = vcmp.lt.s32.totalorder %v427_v10, %v435_v13 }
 0x2e6   : >> { %v449_v15 = vsel %vm448_vm11, %v445_v8, %v1528_v20  ;;  %v443_v18 = vsel %vm442_vm12, %v427_v10, %v435_v13 }
 0x2e7   : >> { %vm452_vm13 = vcmp.lt.s32.totalorder %v401_v44, %v449_v15  ;;  %vm446_vm14 = vcmp.lt.s32.totalorder %v439_v16, %v443_v18 }
 0x2e8   : >> { %v447_v22 = vsel %vm446_vm14, %v439_v16, %v443_v18  ;;  %v453_v23 = vsel %vm452_vm13, %v401_v44, %v449_v15 }
 0x2e9   : >> { %vm450_vm15 = vcmp.gt.s32.totalorder %v447_v22, %v1519_v17  ;;  %472 = vrot.lane.b32.xlu0 %v453_v23, %s1459_s26  ;;  %v456_v28 = vrot.slane %v453_v23, 7  ;;  %v464_v29 = vrot.slane %v453_v23, 1 }
 0x2ea   : >> { %v451_v24 = vsel %vm450_vm15, %v447_v22, %v1519_v17 }
 0x2eb   : >> { %vm454_vm0 = vcmp.lt.s32.totalorder %v403_v46, %v451_v24 }
 0x2ec   : >> { %v455_v25 = vsel %vm454_vm0, %v403_v46, %v451_v24 }
 0x2ed   : >> { %480 = vrot.lane.b32.xlu0 %v453_v23, %s1458_s25  ;;  %474 = vrot.lane.b32.xlu1 %v455_v25, %s1459_s26  ;;  %v457_v26 = vrot.slane %v455_v25, 7  ;;  %v465_v27 = vrot.slane %v455_v25, 1 }
 0x2ef   : >> { %v459_v30 = vsel %vm248_vm1, %v457_v26, %v456_v28  ;;  %v466_v31 = vsel %vm257_vm3, %v464_v29, %v465_v27  ;;  %v458_v33 = vsel %vm248_vm1, %v456_v28, %v457_v26  ;;  %v467_v34 = vsel %vm257_vm3, %v465_v27, %v464_v29 }
 0x2f0   : >> { %vm460_vm4 = vcmp.gt.s32.totalorder %v459_v30, %v1560_v48  ;;  %vm468_vm6 = vcmp.gt.s32.totalorder %v466_v31, %v1562_v49  ;;  %vm462_vm8 = vcmp.gt.s32.totalorder %v458_v33, %v1556_v39  ;;  %vm470_vm9 = vcmp.gt.s32.totalorder %v467_v34, %v1558_v40 }
 0x2f1   : >> { %482 = vrot.lane.b32.xlu1 %v455_v25, %s1458_s25  ;;  %v461_v37 = vsel %vm460_vm4, %v459_v30, %v1560_v48  ;;  %v469_v38 = vsel %vm468_vm6, %v466_v31, %v1562_v49  ;;  %v463_v45 = vsel %vm462_vm8, %v458_v33, %v1556_v39  ;;  %v471_v46 = vsel %vm470_vm9, %v467_v34, %v1558_v40 }
 0x2f2   : >> { %vm488_vm11 = vcmp.lt.s32.totalorder %v461_v37, %v469_v38  ;;  %vm490_vm0 = vcmp.lt.s32.totalorder %v463_v45, %v471_v46 }
 0x2f3   : >> { %v489_v47 = vsel %vm488_vm11, %v461_v37, %v469_v38  ;;  %v491_v56 = vsel %vm490_vm0, %v463_v45, %v471_v46 }
 0x35b   : >> { %v473_v32 = vpop.permute.xlu0 %472 }
 0x35c   : >> { %vm476_vm7 = vcmp.gt.s32.totalorder %v473_v32, %v1539_v35 }
 0x35d   : >> { %v477_v43 = vsel %vm476_vm7, %v473_v32, %v1539_v35 }
 0x35f   : >> { %v481_v41 = vpop.permute.xlu0 %480  ;;  %v475_v42 = vpop.permute.xlu1 %474 }
 0x360   : >> { %vm484_vm10 = vcmp.gt.s32.totalorder %v481_v41, %v1541_v36  ;;  %vm478_vm13 = vcmp.gt.s32.totalorder %v475_v42, %v1539_v35 }
 0x361   : >> { %v485_v44 = vsel %vm484_vm10, %v481_v41, %v1541_v36  ;;  %v479_v53 = vsel %vm478_vm13, %v475_v42, %v1539_v35 }
 0x362   : >> { %vm492_vm12 = vcmp.lt.s32.totalorder %v477_v43, %v485_v44 }
 0x363   : >> { %v493_v50 = vsel %vm492_vm12, %v477_v43, %v485_v44  ;;  %v483_v51 = vpop.permute.xlu1 %482 }
 0x364   : >> { %vm496_vm14 = vcmp.lt.s32.totalorder %v489_v47, %v493_v50  ;;  %vm486_vm15 = vcmp.gt.s32.totalorder %v483_v51, %v1541_v36 }
 0x365   : >> { %v497_v52 = vsel %vm496_vm14, %v489_v47, %v493_v50  ;;  %v487_v54 = vsel %vm486_vm15, %v483_v51, %v1541_v36 }
 0x366   : >> { %vm500_vm4 = vcmp.gt.s32.totalorder %v497_v52, %v1528_v20  ;;  %vm494_vm6 = vcmp.lt.s32.totalorder %v479_v53, %v487_v54 }
 0x367   : >> { %v501_v55 = vsel %vm500_vm4, %v497_v52, %v1528_v20  ;;  %v495_v57 = vsel %vm494_vm6, %v479_v53, %v487_v54 }
 0x368   : >> { %vm504_vm7 = vcmp.lt.s32.totalorder %v453_v23, %v501_v55  ;;  %vm498_vm8 = vcmp.lt.s32.totalorder %v491_v56, %v495_v57 }
 0x369   : >> { %v499_v58 = vsel %vm498_vm8, %v491_v56, %v495_v57  ;;  %v505_v59 = vsel %vm504_vm7, %v453_v23, %v501_v55 }
 0x36a   : >> { %vm502_vm9 = vcmp.gt.s32.totalorder %v499_v58, %v1519_v17  ;;  %524 = vrot.lane.b32.xlu0 %v505_v59, %s1459_s26  ;;  %v508_v0 = vrot.slane %v505_v59, 7  ;;  %v516_v4 = vrot.slane %v505_v59, 1 }
 0x36b   : >> { %v503_v60 = vsel %vm502_vm9, %v499_v58, %v1519_v17 }
 0x36c   : >> { %vm506_vm10 = vcmp.lt.s32.totalorder %v455_v25, %v503_v60 }
 0x36d   : >> { %v507_v61 = vsel %vm506_vm10, %v455_v25, %v503_v60 }
 0x36e   : >> { %532 = vrot.lane.b32.xlu0 %v505_v59, %s1458_s25  ;;  %526 = vrot.lane.b32.xlu1 %v507_v61, %s1459_s26  ;;  %v509_v62 = vrot.slane %v507_v61, 7  ;;  %v517_v63 = vrot.slane %v507_v61, 1 }
 0x370   : >> { %v511_v5 = vsel %vm248_vm1, %v509_v62, %v508_v0  ;;  %v518_v6 = vsel %vm257_vm3, %v516_v4, %v517_v63  ;;  %v510_v8 = vsel %vm248_vm1, %v508_v0, %v509_v62  ;;  %v519_v10 = vsel %vm257_vm3, %v517_v63, %v516_v4 }
 0x371   : >> { %vm512_vm11 = vcmp.gt.s32.totalorder %v511_v5, %v1560_v48  ;;  %vm520_vm12 = vcmp.gt.s32.totalorder %v518_v6, %v1562_v49  ;;  %vm514_vm14 = vcmp.gt.s32.totalorder %v510_v8, %v1556_v39  ;;  %vm522_vm15 = vcmp.gt.s32.totalorder %v519_v10, %v1558_v40 }
 0x372   : >> { %534 = vrot.lane.b32.xlu1 %v507_v61, %s1458_s25  ;;  %v513_v13 = vsel %vm512_vm11, %v511_v5, %v1560_v48  ;;  %v521_v15 = vsel %vm520_vm12, %v518_v6, %v1562_v49  ;;  %v515_v24 = vsel %vm514_vm14, %v510_v8, %v1556_v39  ;;  %v523_v25 = vsel %vm522_vm15, %v519_v10, %v1558_v40 }
 0x373   : >> { %vm540_vm4 = vcmp.lt.s32.totalorder %v513_v13, %v521_v15  ;;  %vm542_vm10 = vcmp.lt.s32.totalorder %v515_v24, %v523_v25 }
 0x374   : >> { %v541_v26 = vsel %vm540_vm4, %v513_v13, %v521_v15  ;;  %v543_v33 = vsel %vm542_vm10, %v515_v24, %v523_v25 }
 0x3dc   : >> { %v525_v7 = vpop.permute.xlu0 %524 }
 0x3dd   : >> { %vm528_vm13 = vcmp.gt.s32.totalorder %v525_v7, %v1539_v35 }
 0x3de   : >> { %v529_v22 = vsel %vm528_vm13, %v525_v7, %v1539_v35 }
 0x3e0   : >> { %v533_v16 = vpop.permute.xlu0 %532  ;;  %v527_v18 = vpop.permute.xlu1 %526 }
 0x3e1   : >> { %vm536_vm0 = vcmp.gt.s32.totalorder %v533_v16, %v1541_v36  ;;  %vm530_vm7 = vcmp.gt.s32.totalorder %v527_v18, %v1539_v35 }
 0x3e2   : >> { %v537_v23 = vsel %vm536_vm0, %v533_v16, %v1541_v36  ;;  %v531_v30 = vsel %vm530_vm7, %v527_v18, %v1539_v35 }
 0x3e3   : >> { %vm544_vm6 = vcmp.lt.s32.totalorder %v529_v22, %v537_v23 }
 0x3e4   : >> { %v545_v27 = vsel %vm544_vm6, %v529_v22, %v537_v23  ;;  %v535_v28 = vpop.permute.xlu1 %534 }
 0x3e5   : >> { %vm548_vm8 = vcmp.lt.s32.totalorder %v541_v26, %v545_v27  ;;  %vm538_vm9 = vcmp.gt.s32.totalorder %v535_v28, %v1541_v36 }
 0x3e6   : >> { %v549_v29 = vsel %vm548_vm8, %v541_v26, %v545_v27  ;;  %v539_v31 = vsel %vm538_vm9, %v535_v28, %v1541_v36 }
 0x3e7   : >> { %vm552_vm11 = vcmp.gt.s32.totalorder %v549_v29, %v1528_v20  ;;  %vm546_vm12 = vcmp.lt.s32.totalorder %v531_v30, %v539_v31 }
 0x3e8   : >> { %v553_v32 = vsel %vm552_vm11, %v549_v29, %v1528_v20  ;;  %v547_v34 = vsel %vm546_vm12, %v531_v30, %v539_v31 }
 0x3e9   : >> { %vm556_vm13 = vcmp.lt.s32.totalorder %v505_v59, %v553_v32  ;;  %vm550_vm14 = vcmp.lt.s32.totalorder %v543_v33, %v547_v34 }
 0x3ea   : >> { %v551_v37 = vsel %vm550_vm14, %v543_v33, %v547_v34  ;;  %v557_v38 = vsel %vm556_vm13, %v505_v59, %v553_v32 }
 0x3eb   : >> { %vm554_vm15 = vcmp.gt.s32.totalorder %v551_v37, %v1519_v17  ;;  %576 = vrot.lane.b32.xlu0 %v557_v38, %s1459_s26  ;;  %v560_v45 = vrot.slane %v557_v38, 7  ;;  %v568_v46 = vrot.slane %v557_v38, 1 }
 0x3ec   : >> { %v555_v41 = vsel %vm554_vm15, %v551_v37, %v1519_v17 }
 0x3ed   : >> { %vm558_vm0 = vcmp.lt.s32.totalorder %v507_v61, %v555_v41 }
 0x3ee   : >> { %v559_v42 = vsel %vm558_vm0, %v507_v61, %v555_v41 }
 0x3ef   : >> { %584 = vrot.lane.b32.xlu0 %v557_v38, %s1458_s25  ;;  %578 = vrot.lane.b32.xlu1 %v559_v42, %s1459_s26  ;;  %v561_v43 = vrot.slane %v559_v42, 7  ;;  %v569_v44 = vrot.slane %v559_v42, 1 }
 0x3f1   : >> { %v563_v47 = vsel %vm248_vm1, %v561_v43, %v560_v45  ;;  %v570_v50 = vsel %vm257_vm3, %v568_v46, %v569_v44  ;;  %v562_v52 = vsel %vm248_vm1, %v560_v45, %v561_v43  ;;  %v571_v53 = vsel %vm257_vm3, %v569_v44, %v568_v46 }
 0x3f2   : >> { %vm564_vm4 = vcmp.gt.s32.totalorder %v563_v47, %v1560_v48  ;;  %vm572_vm6 = vcmp.gt.s32.totalorder %v570_v50, %v1562_v49  ;;  %vm566_vm8 = vcmp.gt.s32.totalorder %v562_v52, %v1556_v39  ;;  %vm574_vm9 = vcmp.gt.s32.totalorder %v571_v53, %v1558_v40 }
 0x3f3   : >> { %586 = vrot.lane.b32.xlu1 %v559_v42, %s1458_s25  ;;  %v565_v54 = vsel %vm564_vm4, %v563_v47, %v1560_v48  ;;  %v573_v55 = vsel %vm572_vm6, %v570_v50, %v1562_v49  ;;  %v567_v60 = vsel %vm566_vm8, %v562_v52, %v1556_v39  ;;  %v575_v61 = vsel %vm574_vm9, %v571_v53, %v1558_v40 }
 0x3f4   : >> { %vm592_vm11 = vcmp.lt.s32.totalorder %v565_v54, %v573_v55  ;;  %vm594_vm0 = vcmp.lt.s32.totalorder %v567_v60, %v575_v61 }
 0x3f5   : >> { %v593_v62 = vsel %vm592_vm11, %v565_v54, %v573_v55  ;;  %v595_v8 = vsel %vm594_vm0, %v567_v60, %v575_v61 }
 0x45d   : >> { %v577_v51 = vpop.permute.xlu0 %576 }
 0x45e   : >> { %vm580_vm7 = vcmp.gt.s32.totalorder %v577_v51, %v1539_v35 }
 0x45f   : >> { %v581_v58 = vsel %vm580_vm7, %v577_v51, %v1539_v35 }
 0x461   : >> { %v585_v56 = vpop.permute.xlu0 %584  ;;  %v579_v57 = vpop.permute.xlu1 %578 }
 0x462   : >> { %vm588_vm10 = vcmp.gt.s32.totalorder %v585_v56, %v1541_v36  ;;  %vm582_vm13 = vcmp.gt.s32.totalorder %v579_v57, %v1539_v35 }
 0x463   : >> { %v589_v59 = vsel %vm588_vm10, %v585_v56, %v1541_v36  ;;  %v583_v5 = vsel %vm582_vm13, %v579_v57, %v1539_v35 }
 0x464   : >> { %vm596_vm12 = vcmp.lt.s32.totalorder %v581_v58, %v589_v59 }
 0x465   : >> { %v597_v63 = vsel %vm596_vm12, %v581_v58, %v589_v59  ;;  %v587_v0 = vpop.permute.xlu1 %586 }
 0x466   : >> { %vm600_vm14 = vcmp.lt.s32.totalorder %v593_v62, %v597_v63  ;;  %vm590_vm15 = vcmp.gt.s32.totalorder %v587_v0, %v1541_v36 }
 0x467   : >> { %v601_v4 = vsel %vm600_vm14, %v593_v62, %v597_v63  ;;  %v591_v6 = vsel %vm590_vm15, %v587_v0, %v1541_v36 }
 0x468   : >> { %vm604_vm4 = vcmp.gt.s32.totalorder %v601_v4, %v1528_v20  ;;  %vm598_vm6 = vcmp.lt.s32.totalorder %v583_v5, %v591_v6 }
 0x469   : >> { %v605_v7 = vsel %vm604_vm4, %v601_v4, %v1528_v20  ;;  %v599_v10 = vsel %vm598_vm6, %v583_v5, %v591_v6 }
 0x46a   : >> { %vm608_vm7 = vcmp.lt.s32.totalorder %v557_v38, %v605_v7  ;;  %vm602_vm8 = vcmp.lt.s32.totalorder %v595_v8, %v599_v10 }
 0x46b   : >> { %v603_v13 = vsel %vm602_vm8, %v595_v8, %v599_v10  ;;  %v609_v15 = vsel %vm608_vm7, %v557_v38, %v605_v7 }
 0x46c   : >> { %vm606_vm9 = vcmp.gt.s32.totalorder %v603_v13, %v1519_v17  ;;  %628 = vrot.lane.b32.xlu0 %v609_v15, %s1459_s26  ;;  %v612_v24 = vrot.slane %v609_v15, 7  ;;  %v620_v25 = vrot.slane %v609_v15, 1 }
 0x46d   : >> { %v607_v16 = vsel %vm606_vm9, %v603_v13, %v1519_v17 }
 0x46e   : >> { %vm610_vm10 = vcmp.lt.s32.totalorder %v559_v42, %v607_v16 }
 0x46f   : >> { %v611_v18 = vsel %vm610_vm10, %v559_v42, %v607_v16 }
 0x470   : >> { %636 = vrot.lane.b32.xlu0 %v609_v15, %s1458_s25  ;;  %630 = vrot.lane.b32.xlu1 %v611_v18, %s1459_s26  ;;  %v613_v22 = vrot.slane %v611_v18, 7  ;;  %v621_v23 = vrot.slane %v611_v18, 1 }
 0x472   : >> { %v615_v26 = vsel %vm248_vm1, %v613_v22, %v612_v24  ;;  %v622_v27 = vsel %vm257_vm3, %v620_v25, %v621_v23  ;;  %v614_v29 = vsel %vm248_vm1, %v612_v24, %v613_v22  ;;  %v623_v30 = vsel %vm257_vm3, %v621_v23, %v620_v25 }
 0x473   : >> { %vm616_vm11 = vcmp.gt.s32.totalorder %v615_v26, %v1560_v48  ;;  %vm624_vm12 = vcmp.gt.s32.totalorder %v622_v27, %v1562_v49  ;;  %vm618_vm14 = vcmp.gt.s32.totalorder %v614_v29, %v1556_v39  ;;  %vm626_vm15 = vcmp.gt.s32.totalorder %v623_v30, %v1558_v40 }
 0x474   : >> { %638 = vrot.lane.b32.xlu1 %v611_v18, %s1458_s25  ;;  %v617_v31 = vsel %vm616_vm11, %v615_v26, %v1560_v48  ;;  %v625_v32 = vsel %vm624_vm12, %v622_v27, %v1562_v49  ;;  %v619_v41 = vsel %vm618_vm14, %v614_v29, %v1556_v39  ;;  %v627_v42 = vsel %vm626_vm15, %v623_v30, %v1558_v40 }
 0x475   : >> { %vm644_vm4 = vcmp.lt.s32.totalorder %v617_v31, %v625_v32  ;;  %vm646_vm10 = vcmp.lt.s32.totalorder %v619_v41, %v627_v42 }
 0x476   : >> { %v645_v43 = vsel %vm644_vm4, %v617_v31, %v625_v32  ;;  %v647_v52 = vsel %vm646_vm10, %v619_v41, %v627_v42 }
 0x4de   : >> { %v629_v28 = vpop.permute.xlu0 %628 }
 0x4df   : >> { %vm632_vm13 = vcmp.gt.s32.totalorder %v629_v28, %v1539_v35 }
 0x4e0   : >> { %v633_v37 = vsel %vm632_vm13, %v629_v28, %v1539_v35 }
 0x4e2   : >> { %v637_v33 = vpop.permute.xlu0 %636  ;;  %v631_v34 = vpop.permute.xlu1 %630 }
 0x4e3   : >> { %vm640_vm0 = vcmp.gt.s32.totalorder %v637_v33, %v1541_v36  ;;  %vm634_vm7 = vcmp.gt.s32.totalorder %v631_v34, %v1539_v35 }
 0x4e4   : >> { %v641_v38 = vsel %vm640_vm0, %v637_v33, %v1541_v36  ;;  %v635_v47 = vsel %vm634_vm7, %v631_v34, %v1539_v35 }
 0x4e5   : >> { %vm648_vm6 = vcmp.lt.s32.totalorder %v633_v37, %v641_v38 }
 0x4e6   : >> { %v649_v44 = vsel %vm648_vm6, %v633_v37, %v641_v38  ;;  %v639_v45 = vpop.permute.xlu1 %638 }
 0x4e7   : >> { %vm652_vm8 = vcmp.lt.s32.totalorder %v645_v43, %v649_v44  ;;  %vm642_vm9 = vcmp.gt.s32.totalorder %v639_v45, %v1541_v36 }
 0x4e8   : >> { %v653_v46 = vsel %vm652_vm8, %v645_v43, %v649_v44  ;;  %v643_v50 = vsel %vm642_vm9, %v639_v45, %v1541_v36 }
 0x4e9   : >> { %vm656_vm11 = vcmp.gt.s32.totalorder %v653_v46, %v1528_v20  ;;  %vm650_vm12 = vcmp.lt.s32.totalorder %v635_v47, %v643_v50 }
 0x4ea   : >> { %v657_v51 = vsel %vm656_vm11, %v653_v46, %v1528_v20  ;;  %v651_v53 = vsel %vm650_vm12, %v635_v47, %v643_v50 }
 0x4eb   : >> { %vm660_vm13 = vcmp.lt.s32.totalorder %v609_v15, %v657_v51  ;;  %vm654_vm14 = vcmp.lt.s32.totalorder %v647_v52, %v651_v53 }
 0x4ec   : >> { %v655_v54 = vsel %vm654_vm14, %v647_v52, %v651_v53  ;;  %v661_v55 = vsel %vm660_vm13, %v609_v15, %v657_v51 }
 0x4ed   : >> { %vm658_vm15 = vcmp.gt.s32.totalorder %v655_v54, %v1519_v17  ;;  %680 = vrot.lane.b32.xlu0 %v661_v55, %s1459_s26  ;;  %v664_v60 = vrot.slane %v661_v55, 7  ;;  %v672_v61 = vrot.slane %v661_v55, 1 }
 0x4ee   : >> { %v659_v56 = vsel %vm658_vm15, %v655_v54, %v1519_v17 }
 0x4ef   : >> { %vm662_vm0 = vcmp.lt.s32.totalorder %v611_v18, %v659_v56 }
 0x4f0   : >> { %v663_v57 = vsel %vm662_vm0, %v611_v18, %v659_v56 }
 0x4f1   : >> { %688 = vrot.lane.b32.xlu0 %v661_v55, %s1458_s25  ;;  %682 = vrot.lane.b32.xlu1 %v663_v57, %s1459_s26  ;;  %v665_v58 = vrot.slane %v663_v57, 7  ;;  %v673_v59 = vrot.slane %v663_v57, 1 }
 0x4f3   : >> { %v667_v62 = vsel %vm248_vm1, %v665_v58, %v664_v60  ;;  %v674_v63 = vsel %vm257_vm3, %v672_v61, %v673_v59  ;;  %v666_v4 = vsel %vm248_vm1, %v664_v60, %v665_v58  ;;  %v675_v5 = vsel %vm257_vm3, %v673_v59, %v672_v61 }
 0x4f4   : >> { %vm668_vm4 = vcmp.gt.s32.totalorder %v667_v62, %v1560_v48  ;;  %vm676_vm6 = vcmp.gt.s32.totalorder %v674_v63, %v1562_v49  ;;  %vm670_vm8 = vcmp.gt.s32.totalorder %v666_v4, %v1556_v39  ;;  %vm678_vm9 = vcmp.gt.s32.totalorder %v675_v5, %v1558_v40 }
 0x4f5   : >> { %690 = vrot.lane.b32.xlu1 %v663_v57, %s1458_s25  ;;  %v669_v6 = vsel %vm668_vm4, %v667_v62, %v1560_v48  ;;  %v677_v7 = vsel %vm676_vm6, %v674_v63, %v1562_v49  ;;  %v671_v16 = vsel %vm670_vm8, %v666_v4, %v1556_v39  ;;  %v679_v18 = vsel %vm678_vm9, %v675_v5, %v1558_v40 }
 0x4f6   : >> { %vm696_vm11 = vcmp.lt.s32.totalorder %v669_v6, %v677_v7  ;;  %vm698_vm0 = vcmp.lt.s32.totalorder %v671_v16, %v679_v18 }
 0x4f7   : >> { %v697_v22 = vsel %vm696_vm11, %v669_v6, %v677_v7  ;;  %v699_v29 = vsel %vm698_vm0, %v671_v16, %v679_v18 }
 0x55f   : >> { %v681_v0 = vpop.permute.xlu0 %680 }
 0x560   : >> { %vm684_vm7 = vcmp.gt.s32.totalorder %v681_v0, %v1539_v35 }
 0x561   : >> { %v685_v13 = vsel %vm684_vm7, %v681_v0, %v1539_v35 }
 0x563   : >> { %v689_v8 = vpop.permute.xlu0 %688  ;;  %v683_v10 = vpop.permute.xlu1 %682 }
 0x564   : >> { %vm692_vm10 = vcmp.gt.s32.totalorder %v689_v8, %v1541_v36  ;;  %vm686_vm13 = vcmp.gt.s32.totalorder %v683_v10, %v1539_v35 }
 0x565   : >> { %v693_v15 = vsel %vm692_vm10, %v689_v8, %v1541_v36  ;;  %v687_v26 = vsel %vm686_vm13, %v683_v10, %v1539_v35 }
 0x566   : >> { %vm700_vm12 = vcmp.lt.s32.totalorder %v685_v13, %v693_v15 }
 0x567   : >> { %v701_v23 = vsel %vm700_vm12, %v685_v13, %v693_v15  ;;  %v691_v24 = vpop.permute.xlu1 %690 }
 0x568   : >> { %vm704_vm14 = vcmp.lt.s32.totalorder %v697_v22, %v701_v23  ;;  %vm694_vm15 = vcmp.gt.s32.totalorder %v691_v24, %v1541_v36 }
 0x569   : >> { %v705_v25 = vsel %vm704_vm14, %v697_v22, %v701_v23  ;;  %v695_v27 = vsel %vm694_vm15, %v691_v24, %v1541_v36 }
 0x56a   : >> { %vm708_vm4 = vcmp.gt.s32.totalorder %v705_v25, %v1528_v20  ;;  %vm702_vm6 = vcmp.lt.s32.totalorder %v687_v26, %v695_v27 }
 0x56b   : >> { %v709_v28 = vsel %vm708_vm4, %v705_v25, %v1528_v20  ;;  %v703_v30 = vsel %vm702_vm6, %v687_v26, %v695_v27 }
 0x56c   : >> { %vm712_vm7 = vcmp.lt.s32.totalorder %v661_v55, %v709_v28  ;;  %vm706_vm8 = vcmp.lt.s32.totalorder %v699_v29, %v703_v30 }
 0x56d   : >> { %v707_v31 = vsel %vm706_vm8, %v699_v29, %v703_v30  ;;  %v713_v32 = vsel %vm712_vm7, %v661_v55, %v709_v28 }
 0x56e   : >> { %vm710_vm9 = vcmp.gt.s32.totalorder %v707_v31, %v1519_v17  ;;  %732 = vrot.lane.b32.xlu0 %v713_v32, %s1459_s26  ;;  %v716_v41 = vrot.slane %v713_v32, 7  ;;  %v724_v42 = vrot.slane %v713_v32, 1 }
 0x56f   : >> { %v711_v33 = vsel %vm710_vm9, %v707_v31, %v1519_v17 }
 0x570   : >> { %vm714_vm10 = vcmp.lt.s32.totalorder %v663_v57, %v711_v33 }
 0x571   : >> { %v715_v34 = vsel %vm714_vm10, %v663_v57, %v711_v33 }
 0x572   : >> { %740 = vrot.lane.b32.xlu0 %v713_v32, %s1458_s25  ;;  %734 = vrot.lane.b32.xlu1 %v715_v34, %s1459_s26  ;;  %v717_v37 = vrot.slane %v715_v34, 7  ;;  %v725_v38 = vrot.slane %v715_v34, 1 }
 0x574   : >> { %v719_v43 = vsel %vm248_vm1, %v717_v37, %v716_v41  ;;  %v726_v44 = vsel %vm257_vm3, %v724_v42, %v725_v38  ;;  %v718_v46 = vsel %vm248_vm1, %v716_v41, %v717_v37  ;;  %v727_v47 = vsel %vm257_vm3, %v725_v38, %v724_v42 }
 0x575   : >> { %vm720_vm11 = vcmp.gt.s32.totalorder %v719_v43, %v1560_v48  ;;  %vm728_vm12 = vcmp.gt.s32.totalorder %v726_v44, %v1562_v49  ;;  %vm722_vm14 = vcmp.gt.s32.totalorder %v718_v46, %v1556_v39  ;;  %vm730_vm15 = vcmp.gt.s32.totalorder %v727_v47, %v1558_v40 }
 0x576   : >> { %742 = vrot.lane.b32.xlu1 %v715_v34, %s1458_s25  ;;  %v721_v50 = vsel %vm720_vm11, %v719_v43, %v1560_v48  ;;  %v729_v51 = vsel %vm728_vm12, %v726_v44, %v1562_v49  ;;  %v723_v56 = vsel %vm722_vm14, %v718_v46, %v1556_v39  ;;  %v731_v57 = vsel %vm730_vm15, %v727_v47, %v1558_v40 }
 0x577   : >> { %vm748_vm4 = vcmp.lt.s32.totalorder %v721_v50, %v729_v51  ;;  %vm750_vm10 = vcmp.lt.s32.totalorder %v723_v56, %v731_v57 }
 0x578   : >> { %v749_v58 = vsel %vm748_vm4, %v721_v50, %v729_v51  ;;  %v751_v4 = vsel %vm750_vm10, %v723_v56, %v731_v57 }
 0x5e0   : >> { %v733_v45 = vpop.permute.xlu0 %732 }
 0x5e1   : >> { %vm736_vm13 = vcmp.gt.s32.totalorder %v733_v45, %v1539_v35 }
 0x5e2   : >> { %v737_v54 = vsel %vm736_vm13, %v733_v45, %v1539_v35 }
 0x5e4   : >> { %v741_v52 = vpop.permute.xlu0 %740  ;;  %v735_v53 = vpop.permute.xlu1 %734 }
 0x5e5   : >> { %vm744_vm0 = vcmp.gt.s32.totalorder %v741_v52, %v1541_v36  ;;  %vm738_vm7 = vcmp.gt.s32.totalorder %v735_v53, %v1539_v35 }
 0x5e6   : >> { %v745_v55 = vsel %vm744_vm0, %v741_v52, %v1541_v36  ;;  %v739_v62 = vsel %vm738_vm7, %v735_v53, %v1539_v35 }
 0x5e7   : >> { %vm752_vm6 = vcmp.lt.s32.totalorder %v737_v54, %v745_v55 }
 0x5e8   : >> { %v753_v59 = vsel %vm752_vm6, %v737_v54, %v745_v55  ;;  %v743_v60 = vpop.permute.xlu1 %742 }
 0x5e9   : >> { %vm756_vm8 = vcmp.lt.s32.totalorder %v749_v58, %v753_v59  ;;  %vm746_vm9 = vcmp.gt.s32.totalorder %v743_v60, %v1541_v36 }
 0x5ea   : >> { %v757_v61 = vsel %vm756_vm8, %v749_v58, %v753_v59  ;;  %v747_v63 = vsel %vm746_vm9, %v743_v60, %v1541_v36 }
 0x5eb   : >> { %vm760_vm11 = vcmp.gt.s32.totalorder %v757_v61, %v1528_v20  ;;  %vm754_vm12 = vcmp.lt.s32.totalorder %v739_v62, %v747_v63 }
 0x5ec   : >> { %v761_v0 = vsel %vm760_vm11, %v757_v61, %v1528_v20  ;;  %v755_v5 = vsel %vm754_vm12, %v739_v62, %v747_v63 }
 0x5ed   : >> { %vm764_vm13 = vcmp.lt.s32.totalorder %v713_v32, %v761_v0  ;;  %vm758_vm14 = vcmp.lt.s32.totalorder %v751_v4, %v755_v5 }
 0x5ee   : >> { %v759_v6 = vsel %vm758_vm14, %v751_v4, %v755_v5  ;;  %v765_v7 = vsel %vm764_vm13, %v713_v32, %v761_v0 }
 0x5ef   : >> { %vm762_vm15 = vcmp.gt.s32.totalorder %v759_v6, %v1519_v17  ;;  %784 = vrot.lane.b32.xlu0 %v765_v7, %s1459_s26  ;;  %v768_v16 = vrot.slane %v765_v7, 7  ;;  %v776_v18 = vrot.slane %v765_v7, 1 }
 0x5f0   : >> { %v763_v8 = vsel %vm762_vm15, %v759_v6, %v1519_v17 }
 0x5f1   : >> { %vm766_vm0 = vcmp.lt.s32.totalorder %v715_v34, %v763_v8 }
 0x5f2   : >> { %v767_v10 = vsel %vm766_vm0, %v715_v34, %v763_v8 }
 0x5f3   : >> { %792 = vrot.lane.b32.xlu0 %v765_v7, %s1458_s25  ;;  %786 = vrot.lane.b32.xlu1 %v767_v10, %s1459_s26  ;;  %v769_v13 = vrot.slane %v767_v10, 7  ;;  %v777_v15 = vrot.slane %v767_v10, 1 }
 0x5f5   : >> { %v771_v22 = vsel %vm248_vm1, %v769_v13, %v768_v16  ;;  %v778_v23 = vsel %vm257_vm3, %v776_v18, %v777_v15  ;;  %v770_v25 = vsel %vm248_vm1, %v768_v16, %v769_v13  ;;  %v779_v26 = vsel %vm257_vm3, %v777_v15, %v776_v18 }
 0x5f6   : >> { %vm772_vm4 = vcmp.gt.s32.totalorder %v771_v22, %v1560_v48  ;;  %vm780_vm6 = vcmp.gt.s32.totalorder %v778_v23, %v1562_v49  ;;  %vm774_vm8 = vcmp.gt.s32.totalorder %v770_v25, %v1556_v39  ;;  %vm782_vm9 = vcmp.gt.s32.totalorder %v779_v26, %v1558_v40 }
 0x5f7   : >> { %794 = vrot.lane.b32.xlu1 %v767_v10, %s1458_s25  ;;  %v773_v27 = vsel %vm772_vm4, %v771_v22, %v1560_v48  ;;  %v781_v28 = vsel %vm780_vm6, %v778_v23, %v1562_v49  ;;  %v775_v33 = vsel %vm774_vm8, %v770_v25, %v1556_v39  ;;  %v783_v34 = vsel %vm782_vm9, %v779_v26, %v1558_v40 }
 0x5f8   : >> { %vm800_vm11 = vcmp.lt.s32.totalorder %v773_v27, %v781_v28  ;;  %vm802_vm0 = vcmp.lt.s32.totalorder %v775_v33, %v783_v34 }
 0x5f9   : >> { %v801_v37 = vsel %vm800_vm11, %v773_v27, %v781_v28  ;;  %v803_v46 = vsel %vm802_vm0, %v775_v33, %v783_v34 }
 0x661   : >> { %v785_v24 = vpop.permute.xlu0 %784 }
 0x662   : >> { %vm788_vm7 = vcmp.gt.s32.totalorder %v785_v24, %v1539_v35 }
 0x663   : >> { %v789_v31 = vsel %vm788_vm7, %v785_v24, %v1539_v35 }
 0x665   : >> { %v793_v29 = vpop.permute.xlu0 %792  ;;  %v787_v30 = vpop.permute.xlu1 %786 }
 0x666   : >> { %vm796_vm10 = vcmp.gt.s32.totalorder %v793_v29, %v1541_v36  ;;  %vm790_vm13 = vcmp.gt.s32.totalorder %v787_v30, %v1539_v35 }
 0x667   : >> { %v797_v32 = vsel %vm796_vm10, %v793_v29, %v1541_v36  ;;  %v791_v43 = vsel %vm790_vm13, %v787_v30, %v1539_v35 }
 0x668   : >> { %vm804_vm12 = vcmp.lt.s32.totalorder %v789_v31, %v797_v32 }
 0x669   : >> { %v805_v38 = vsel %vm804_vm12, %v789_v31, %v797_v32  ;;  %v795_v41 = vpop.permute.xlu1 %794 }
 0x66a   : >> { %vm808_vm14 = vcmp.lt.s32.totalorder %v801_v37, %v805_v38  ;;  %vm798_vm15 = vcmp.gt.s32.totalorder %v795_v41, %v1541_v36 }
 0x66b   : >> { %v809_v42 = vsel %vm808_vm14, %v801_v37, %v805_v38  ;;  %v799_v44 = vsel %vm798_vm15, %v795_v41, %v1541_v36 }
 0x66c   : >> { %vm812_vm4 = vcmp.gt.s32.totalorder %v809_v42, %v1528_v20  ;;  %vm806_vm6 = vcmp.lt.s32.totalorder %v791_v43, %v799_v44 }
 0x66d   : >> { %v813_v45 = vsel %vm812_vm4, %v809_v42, %v1528_v20  ;;  %v807_v47 = vsel %vm806_vm6, %v791_v43, %v799_v44 }
 0x66e   : >> { %vm816_vm7 = vcmp.lt.s32.totalorder %v765_v7, %v813_v45  ;;  %vm810_vm8 = vcmp.lt.s32.totalorder %v803_v46, %v807_v47 }
 0x66f   : >> { %v811_v50 = vsel %vm810_vm8, %v803_v46, %v807_v47  ;;  %v817_v51 = vsel %vm816_vm7, %v765_v7, %v813_v45 }
 0x670   : >> { %vm814_vm9 = vcmp.gt.s32.totalorder %v811_v50, %v1519_v17  ;;  %836 = vrot.lane.b32.xlu0 %v817_v51, %s1459_s26  ;;  %v820_v56 = vrot.slane %v817_v51, 7  ;;  %v828_v57 = vrot.slane %v817_v51, 1 }
 0x671   : >> { %v815_v52 = vsel %vm814_vm9, %v811_v50, %v1519_v17 }
 0x672   : >> { %vm818_vm10 = vcmp.lt.s32.totalorder %v767_v10, %v815_v52 }
 0x673   : >> { %v819_v53 = vsel %vm818_vm10, %v767_v10, %v815_v52 }
 0x674   : >> { %844 = vrot.lane.b32.xlu0 %v817_v51, %s1458_s25  ;;  %838 = vrot.lane.b32.xlu1 %v819_v53, %s1459_s26  ;;  %v821_v54 = vrot.slane %v819_v53, 7  ;;  %v829_v55 = vrot.slane %v819_v53, 1 }
 0x676   : >> { %v823_v58 = vsel %vm248_vm1, %v821_v54, %v820_v56  ;;  %v830_v59 = vsel %vm257_vm3, %v828_v57, %v829_v55  ;;  %v822_v61 = vsel %vm248_vm1, %v820_v56, %v821_v54  ;;  %v831_v62 = vsel %vm257_vm3, %v829_v55, %v828_v57 }
 0x677   : >> { %vm824_vm11 = vcmp.gt.s32.totalorder %v823_v58, %v1560_v48  ;;  %vm832_vm12 = vcmp.gt.s32.totalorder %v830_v59, %v1562_v49  ;;  %vm826_vm14 = vcmp.gt.s32.totalorder %v822_v61, %v1556_v39  ;;  %vm834_vm15 = vcmp.gt.s32.totalorder %v831_v62, %v1558_v40 }
 0x678   : >> { %846 = vrot.lane.b32.xlu1 %v819_v53, %s1458_s25  ;;  %v825_v63 = vsel %vm824_vm11, %v823_v58, %v1560_v48  ;;  %v833_v0 = vsel %vm832_vm12, %v830_v59, %v1562_v49  ;;  %v827_v8 = vsel %vm826_vm14, %v822_v61, %v1556_v39  ;;  %v835_v10 = vsel %vm834_vm15, %v831_v62, %v1558_v40 }
 0x679   : >> { %vm852_vm4 = vcmp.lt.s32.totalorder %v825_v63, %v833_v0  ;;  %vm854_vm10 = vcmp.lt.s32.totalorder %v827_v8, %v835_v10 }
 0x67a   : >> { %v853_v13 = vsel %vm852_vm4, %v825_v63, %v833_v0  ;;  %v855_v25 = vsel %vm854_vm10, %v827_v8, %v835_v10 }
 0x6e2   : >> { %v837_v60 = vpop.permute.xlu0 %836 }
 0x6e3   : >> { %vm840_vm13 = vcmp.gt.s32.totalorder %v837_v60, %v1539_v35 }
 0x6e4   : >> { %v841_v6 = vsel %vm840_vm13, %v837_v60, %v1539_v35 }
 0x6e6   : >> { %v845_v4 = vpop.permute.xlu0 %844  ;;  %v839_v5 = vpop.permute.xlu1 %838 }
 0x6e7   : >> { %vm848_vm0 = vcmp.gt.s32.totalorder %v845_v4, %v1541_v36  ;;  %vm842_vm7 = vcmp.gt.s32.totalorder %v839_v5, %v1539_v35 }
 0x6e8   : >> { %v849_v7 = vsel %vm848_vm0, %v845_v4, %v1541_v36  ;;  %v843_v22 = vsel %vm842_vm7, %v839_v5, %v1539_v35 }
 0x6e9   : >> { %vm856_vm6 = vcmp.lt.s32.totalorder %v841_v6, %v849_v7 }
 0x6ea   : >> { %v857_v15 = vsel %vm856_vm6, %v841_v6, %v849_v7  ;;  %v847_v16 = vpop.permute.xlu1 %846 }
 0x6eb   : >> { %vm860_vm8 = vcmp.lt.s32.totalorder %v853_v13, %v857_v15  ;;  %vm850_vm9 = vcmp.gt.s32.totalorder %v847_v16, %v1541_v36 }
 0x6ec   : >> { %v861_v18 = vsel %vm860_vm8, %v853_v13, %v857_v15  ;;  %v851_v23 = vsel %vm850_vm9, %v847_v16, %v1541_v36 }
 0x6ed   : >> { %vm864_vm11 = vcmp.gt.s32.totalorder %v861_v18, %v1528_v20  ;;  %vm858_vm12 = vcmp.lt.s32.totalorder %v843_v22, %v851_v23 }
 0x6ee   : >> { %v865_v24 = vsel %vm864_vm11, %v861_v18, %v1528_v20  ;;  %v859_v26 = vsel %vm858_vm12, %v843_v22, %v851_v23 }
 0x6ef   : >> { %vm868_vm13 = vcmp.lt.s32.totalorder %v817_v51, %v865_v24  ;;  %vm862_vm14 = vcmp.lt.s32.totalorder %v855_v25, %v859_v26 }
 0x6f0   : >> { %v863_v27 = vsel %vm862_vm14, %v855_v25, %v859_v26  ;;  %v869_v28 = vsel %vm868_vm13, %v817_v51, %v865_v24 }
 0x6f1   : >> { %vm866_vm15 = vcmp.gt.s32.totalorder %v863_v27, %v1519_v17  ;;  %888 = vrot.lane.b32.xlu0 %v869_v28, %s1459_s26  ;;  %v872_v33 = vrot.slane %v869_v28, 7  ;;  %v880_v34 = vrot.slane %v869_v28, 1 }
 0x6f2   : >> { %v867_v29 = vsel %vm866_vm15, %v863_v27, %v1519_v17 }
 0x6f3   : >> { %vm870_vm0 = vcmp.lt.s32.totalorder %v819_v53, %v867_v29 }
 0x6f4   : >> { %v871_v30 = vsel %vm870_vm0, %v819_v53, %v867_v29 }
 0x6f5   : >> { %896 = vrot.lane.b32.xlu0 %v869_v28, %s1458_s25  ;;  %890 = vrot.lane.b32.xlu1 %v871_v30, %s1459_s26  ;;  %v873_v31 = vrot.slane %v871_v30, 7  ;;  %v881_v32 = vrot.slane %v871_v30, 1 }
 0x6f7   : >> { %v875_v37 = vsel %vm248_vm1, %v873_v31, %v872_v33  ;;  %v882_v38 = vsel %vm257_vm3, %v880_v34, %v881_v32  ;;  %v874_v42 = vsel %vm248_vm1, %v872_v33, %v873_v31  ;;  %v883_v43 = vsel %vm257_vm3, %v881_v32, %v880_v34 }
 0x6f8   : >> { %vm876_vm4 = vcmp.gt.s32.totalorder %v875_v37, %v1560_v48  ;;  %vm884_vm6 = vcmp.gt.s32.totalorder %v882_v38, %v1562_v49  ;;  %vm878_vm8 = vcmp.gt.s32.totalorder %v874_v42, %v1556_v39  ;;  %vm886_vm9 = vcmp.gt.s32.totalorder %v883_v43, %v1558_v40 }
 0x6f9   : >> { %898 = vrot.lane.b32.xlu1 %v871_v30, %s1458_s25  ;;  %v877_v44 = vsel %vm876_vm4, %v875_v37, %v1560_v48  ;;  %v885_v45 = vsel %vm884_vm6, %v882_v38, %v1562_v49  ;;  %v879_v52 = vsel %vm878_vm8, %v874_v42, %v1556_v39  ;;  %v887_v53 = vsel %vm886_vm9, %v883_v43, %v1558_v40 }
 0x6fa   : >> { %vm904_vm11 = vcmp.lt.s32.totalorder %v877_v44, %v885_v45  ;;  %vm906_vm0 = vcmp.lt.s32.totalorder %v879_v52, %v887_v53 }
 0x6fb   : >> { %v905_v54 = vsel %vm904_vm11, %v877_v44, %v885_v45  ;;  %v907_v61 = vsel %vm906_vm0, %v879_v52, %v887_v53 }
 0x763   : >> { %v889_v41 = vpop.permute.xlu0 %888 }
 0x764   : >> { %vm892_vm7 = vcmp.gt.s32.totalorder %v889_v41, %v1539_v35 }
 0x765   : >> { %v893_v50 = vsel %vm892_vm7, %v889_v41, %v1539_v35 }
 0x767   : >> { %v897_v46 = vpop.permute.xlu0 %896  ;;  %v891_v47 = vpop.permute.xlu1 %890 }
 0x768   : >> { %vm900_vm10 = vcmp.gt.s32.totalorder %v897_v46, %v1541_v36  ;;  %vm894_vm13 = vcmp.gt.s32.totalorder %v891_v47, %v1539_v35 }
 0x769   : >> { %v901_v51 = vsel %vm900_vm10, %v897_v46, %v1541_v36  ;;  %v895_v58 = vsel %vm894_vm13, %v891_v47, %v1539_v35 }
 0x76a   : >> { %vm908_vm12 = vcmp.lt.s32.totalorder %v893_v50, %v901_v51 }
 0x76b   : >> { %v909_v55 = vsel %vm908_vm12, %v893_v50, %v901_v51  ;;  %v899_v56 = vpop.permute.xlu1 %898 }
 0x76c   : >> { %vm912_vm14 = vcmp.lt.s32.totalorder %v905_v54, %v909_v55  ;;  %vm902_vm15 = vcmp.gt.s32.totalorder %v899_v56, %v1541_v36 }
 0x76d   : >> { %v913_v57 = vsel %vm912_vm14, %v905_v54, %v909_v55  ;;  %v903_v59 = vsel %vm902_vm15, %v899_v56, %v1541_v36 }
 0x76e   : >> { %vm916_vm4 = vcmp.gt.s32.totalorder %v913_v57, %v1528_v20  ;;  %vm910_vm6 = vcmp.lt.s32.totalorder %v895_v58, %v903_v59 }
 0x76f   : >> { %v917_v60 = vsel %vm916_vm4, %v913_v57, %v1528_v20  ;;  %v911_v62 = vsel %vm910_vm6, %v895_v58, %v903_v59 }
 0x770   : >> { %vm920_vm7 = vcmp.lt.s32.totalorder %v869_v28, %v917_v60  ;;  %vm914_vm8 = vcmp.lt.s32.totalorder %v907_v61, %v911_v62 }
 0x771   : >> { %v915_v63 = vsel %vm914_vm8, %v907_v61, %v911_v62  ;;  %v921_v0 = vsel %vm920_vm7, %v869_v28, %v917_v60 }
 0x772   : >> { %vm918_vm9 = vcmp.gt.s32.totalorder %v915_v63, %v1519_v17  ;;  %940 = vrot.lane.b32.xlu0 %v921_v0, %s1459_s26  ;;  %v924_v8 = vrot.slane %v921_v0, 7  ;;  %v932_v10 = vrot.slane %v921_v0, 1 }
 0x773   : >> { %v919_v4 = vsel %vm918_vm9, %v915_v63, %v1519_v17 }
 0x774   : >> { %vm922_vm10 = vcmp.lt.s32.totalorder %v871_v30, %v919_v4 }
 0x775   : >> { %v923_v5 = vsel %vm922_vm10, %v871_v30, %v919_v4 }
 0x776   : >> { %948 = vrot.lane.b32.xlu0 %v921_v0, %s1458_s25  ;;  %942 = vrot.lane.b32.xlu1 %v923_v5, %s1459_s26  ;;  %v925_v6 = vrot.slane %v923_v5, 7  ;;  %v933_v7 = vrot.slane %v923_v5, 1 }
 0x778   : >> { %v927_v13 = vsel %vm248_vm1, %v925_v6, %v924_v8  ;;  %v934_v15 = vsel %vm257_vm3, %v932_v10, %v933_v7  ;;  %v926_v18 = vsel %vm248_vm1, %v924_v8, %v925_v6  ;;  %v935_v22 = vsel %vm257_vm3, %v933_v7, %v932_v10 }
 0x779   : >> { %vm928_vm11 = vcmp.gt.s32.totalorder %v927_v13, %v1560_v48  ;;  %vm936_vm12 = vcmp.gt.s32.totalorder %v934_v15, %v1562_v49  ;;  %vm930_vm14 = vcmp.gt.s32.totalorder %v926_v18, %v1556_v39  ;;  %vm938_vm15 = vcmp.gt.s32.totalorder %v935_v22, %v1558_v40 }
 0x77a   : >> { %950 = vrot.lane.b32.xlu1 %v923_v5, %s1458_s25  ;;  %v929_v23 = vsel %vm928_vm11, %v927_v13, %v1560_v48  ;;  %v937_v24 = vsel %vm936_vm12, %v934_v15, %v1562_v49  ;;  %v931_v29 = vsel %vm930_vm14, %v926_v18, %v1556_v39  ;;  %v939_v30 = vsel %vm938_vm15, %v935_v22, %v1558_v40 }
 0x77b   : >> { %vm956_vm4 = vcmp.lt.s32.totalorder %v929_v23, %v937_v24  ;;  %vm958_vm10 = vcmp.lt.s32.totalorder %v931_v29, %v939_v30 }
 0x77c   : >> { %v957_v31 = vsel %vm956_vm4, %v929_v23, %v937_v24  ;;  %v959_v42 = vsel %vm958_vm10, %v931_v29, %v939_v30 }
 0x7e4   : >> { %v941_v16 = vpop.permute.xlu0 %940 }
 0x7e5   : >> { %vm944_vm13 = vcmp.gt.s32.totalorder %v941_v16, %v1539_v35 }
 0x7e6   : >> { %v945_v27 = vsel %vm944_vm13, %v941_v16, %v1539_v35 }
 0x7e8   : >> { %v949_v25 = vpop.permute.xlu0 %948  ;;  %v943_v26 = vpop.permute.xlu1 %942 }
 0x7e9   : >> { %vm952_vm0 = vcmp.gt.s32.totalorder %v949_v25, %v1541_v36  ;;  %vm946_vm7 = vcmp.gt.s32.totalorder %v943_v26, %v1539_v35 }
 0x7ea   : >> { %v953_v28 = vsel %vm952_vm0, %v949_v25, %v1541_v36  ;;  %v947_v37 = vsel %vm946_vm7, %v943_v26, %v1539_v35 }
 0x7eb   : >> { %vm960_vm6 = vcmp.lt.s32.totalorder %v945_v27, %v953_v28 }
 0x7ec   : >> { %v961_v32 = vsel %vm960_vm6, %v945_v27, %v953_v28  ;;  %v951_v33 = vpop.permute.xlu1 %950 }
 0x7ed   : >> { %vm964_vm8 = vcmp.lt.s32.totalorder %v957_v31, %v961_v32  ;;  %vm954_vm9 = vcmp.gt.s32.totalorder %v951_v33, %v1541_v36 }
 0x7ee   : >> { %v965_v34 = vsel %vm964_vm8, %v957_v31, %v961_v32  ;;  %v955_v38 = vsel %vm954_vm9, %v951_v33, %v1541_v36 }
 0x7ef   : >> { %vm968_vm11 = vcmp.gt.s32.totalorder %v965_v34, %v1528_v20  ;;  %vm962_vm12 = vcmp.lt.s32.totalorder %v947_v37, %v955_v38 }
 0x7f0   : >> { %v969_v41 = vsel %vm968_vm11, %v965_v34, %v1528_v20  ;;  %v963_v43 = vsel %vm962_vm12, %v947_v37, %v955_v38 }
 0x7f1   : >> { %vm972_vm13 = vcmp.lt.s32.totalorder %v921_v0, %v969_v41  ;;  %vm966_vm14 = vcmp.lt.s32.totalorder %v959_v42, %v963_v43 }
 0x7f2   : >> { %v967_v44 = vsel %vm966_vm14, %v959_v42, %v963_v43  ;;  %v973_v45 = vsel %vm972_vm13, %v921_v0, %v969_v41 }
 0x7f3   : >> { %vm970_vm15 = vcmp.gt.s32.totalorder %v967_v44, %v1519_v17  ;;  %992 = vrot.lane.b32.xlu0 %v973_v45, %s1459_s26  ;;  %v976_v52 = vrot.slane %v973_v45, 7  ;;  %v984_v53 = vrot.slane %v973_v45, 1 }
 0x7f4   : >> { %v971_v46 = vsel %vm970_vm15, %v967_v44, %v1519_v17 }
 0x7f5   : >> { %vm974_vm0 = vcmp.lt.s32.totalorder %v923_v5, %v971_v46 }
 0x7f6   : >> { %v975_v47 = vsel %vm974_vm0, %v923_v5, %v971_v46 }
 0x7f7   : >> { %1000 = vrot.lane.b32.xlu0 %v973_v45, %s1458_s25  ;;  %994 = vrot.lane.b32.xlu1 %v975_v47, %s1459_s26  ;;  %v977_v50 = vrot.slane %v975_v47, 7  ;;  %v985_v51 = vrot.slane %v975_v47, 1 }
 0x7f9   : >> { %v979_v54 = vsel %vm248_vm1, %v977_v50, %v976_v52  ;;  %v986_v55 = vsel %vm257_vm3, %v984_v53, %v985_v51  ;;  %v978_v57 = vsel %vm248_vm1, %v976_v52, %v977_v50  ;;  %v987_v58 = vsel %vm257_vm3, %v985_v51, %v984_v53 }
 0x7fa   : >> { %vm980_vm4 = vcmp.gt.s32.totalorder %v979_v54, %v1560_v48  ;;  %vm988_vm6 = vcmp.gt.s32.totalorder %v986_v55, %v1562_v49  ;;  %vm982_vm8 = vcmp.gt.s32.totalorder %v978_v57, %v1556_v39  ;;  %vm990_vm9 = vcmp.gt.s32.totalorder %v987_v58, %v1558_v40 }
 0x7fb   : >> { %1002 = vrot.lane.b32.xlu1 %v975_v47, %s1458_s25  ;;  %v981_v59 = vsel %vm980_vm4, %v979_v54, %v1560_v48  ;;  %v989_v60 = vsel %vm988_vm6, %v986_v55, %v1562_v49  ;;  %v983_v4 = vsel %vm982_vm8, %v978_v57, %v1556_v39  ;;  %v991_v5 = vsel %vm990_vm9, %v987_v58, %v1558_v40 }
 0x7fc   : >> { %vm1008_vm11 = vcmp.lt.s32.totalorder %v981_v59, %v989_v60  ;;  %vm1010_vm0 = vcmp.lt.s32.totalorder %v983_v4, %v991_v5 }
 0x7fd   : >> { %v1009_v6 = vsel %vm1008_vm11, %v981_v59, %v989_v60  ;;  %v1011_v18 = vsel %vm1010_vm0, %v983_v4, %v991_v5 }
 0x865   : >> { %v993_v56 = vpop.permute.xlu0 %992 }
 0x866   : >> { %vm996_vm7 = vcmp.gt.s32.totalorder %v993_v56, %v1539_v35 }
 0x867   : >> { %v997_v63 = vsel %vm996_vm7, %v993_v56, %v1539_v35 }
 0x869   : >> { %v1001_v61 = vpop.permute.xlu0 %1000  ;;  %v995_v62 = vpop.permute.xlu1 %994 }
 0x86a   : >> { %vm1004_vm10 = vcmp.gt.s32.totalorder %v1001_v61, %v1541_v36  ;;  %vm998_vm13 = vcmp.gt.s32.totalorder %v995_v62, %v1539_v35 }
 0x86b   : >> { %v1005_v0 = vsel %vm1004_vm10, %v1001_v61, %v1541_v36  ;;  %v999_v13 = vsel %vm998_vm13, %v995_v62, %v1539_v35 }
 0x86c   : >> { %vm1012_vm12 = vcmp.lt.s32.totalorder %v997_v63, %v1005_v0 }
 0x86d   : >> { %v1013_v7 = vsel %vm1012_vm12, %v997_v63, %v1005_v0  ;;  %v1003_v8 = vpop.permute.xlu1 %1002 }
 0x86e   : >> { %vm1016_vm14 = vcmp.lt.s32.totalorder %v1009_v6, %v1013_v7  ;;  %vm1006_vm15 = vcmp.gt.s32.totalorder %v1003_v8, %v1541_v36 }
 0x86f   : >> { %v1017_v10 = vsel %vm1016_vm14, %v1009_v6, %v1013_v7  ;;  %v1007_v15 = vsel %vm1006_vm15, %v1003_v8, %v1541_v36 }
 0x870   : >> { %vm1020_vm4 = vcmp.gt.s32.totalorder %v1017_v10, %v1528_v20  ;;  %vm1014_vm6 = vcmp.lt.s32.totalorder %v999_v13, %v1007_v15 }
 0x871   : >> { %v1021_v16 = vsel %vm1020_vm4, %v1017_v10, %v1528_v20  ;;  %v1015_v22 = vsel %vm1014_vm6, %v999_v13, %v1007_v15 }
 0x872   : >> { %vm1024_vm7 = vcmp.lt.s32.totalorder %v973_v45, %v1021_v16  ;;  %vm1018_vm8 = vcmp.lt.s32.totalorder %v1011_v18, %v1015_v22 }
 0x873   : >> { %v1019_v23 = vsel %vm1018_vm8, %v1011_v18, %v1015_v22  ;;  %v1025_v24 = vsel %vm1024_vm7, %v973_v45, %v1021_v16 }
 0x874   : >> { %vm1022_vm9 = vcmp.gt.s32.totalorder %v1019_v23, %v1519_v17  ;;  %1044 = vrot.lane.b32.xlu0 %v1025_v24, %s1459_s26  ;;  %v1028_v29 = vrot.slane %v1025_v24, 7  ;;  %v1036_v30 = vrot.slane %v1025_v24, 1 }
 0x875   : >> { %v1023_v25 = vsel %vm1022_vm9, %v1019_v23, %v1519_v17 }
 0x876   : >> { %vm1026_vm10 = vcmp.lt.s32.totalorder %v975_v47, %v1023_v25 }
 0x877   : >> { %v1027_v26 = vsel %vm1026_vm10, %v975_v47, %v1023_v25 }
 0x878   : >> { %1052 = vrot.lane.b32.xlu0 %v1025_v24, %s1458_s25  ;;  %1046 = vrot.lane.b32.xlu1 %v1027_v26, %s1459_s26  ;;  %v1029_v27 = vrot.slane %v1027_v26, 7  ;;  %v1037_v28 = vrot.slane %v1027_v26, 1 }
 0x87a   : >> { %v1031_v31 = vsel %vm248_vm1, %v1029_v27, %v1028_v29  ;;  %v1038_v32 = vsel %vm257_vm3, %v1036_v30, %v1037_v28  ;;  %v1030_v34 = vsel %vm248_vm1, %v1028_v29, %v1029_v27  ;;  %v1039_v37 = vsel %vm257_vm3, %v1037_v28, %v1036_v30 }
 0x87b   : >> { %vm1032_vm11 = vcmp.gt.s32.totalorder %v1031_v31, %v1560_v48  ;;  %vm1040_vm12 = vcmp.gt.s32.totalorder %v1038_v32, %v1562_v49  ;;  %vm1034_vm14 = vcmp.gt.s32.totalorder %v1030_v34, %v1556_v39  ;;  %vm1042_vm15 = vcmp.gt.s32.totalorder %v1039_v37, %v1558_v40 }
 0x87c   : >> { %1054 = vrot.lane.b32.xlu1 %v1027_v26, %s1458_s25  ;;  %v1033_v38 = vsel %vm1032_vm11, %v1031_v31, %v1560_v48  ;;  %v1041_v41 = vsel %vm1040_vm12, %v1038_v32, %v1562_v49  ;;  %v1035_v46 = vsel %vm1034_vm14, %v1030_v34, %v1556_v39  ;;  %v1043_v47 = vsel %vm1042_vm15, %v1039_v37, %v1558_v40 }
 0x87d   : >> { %vm1060_vm4 = vcmp.lt.s32.totalorder %v1033_v38, %v1041_v41  ;;  %vm1062_vm8 = vcmp.lt.s32.totalorder %v1035_v46, %v1043_v47 }
 0x87e   : >> { %v1061_v50 = vsel %vm1060_vm4, %v1033_v38, %v1041_v41  ;;  %v1063_v57 = vsel %vm1062_vm8, %v1035_v46, %v1043_v47 }
 0x8e6   : >> { %v1045_v33 = vpop.permute.xlu0 %1044 }
 0x8e7   : >> { %vm1048_vm13 = vcmp.gt.s32.totalorder %v1045_v33, %v1539_v35 }
 0x8e8   : >> { %v1049_v44 = vsel %vm1048_vm13, %v1045_v33, %v1539_v35 }
 0x8ea   : >> { %v1053_v42 = vpop.permute.xlu0 %1052  ;;  %v1047_v43 = vpop.permute.xlu1 %1046 }
 0x8eb   : >> { %vm1056_vm0 = vcmp.gt.s32.totalorder %v1053_v42, %v1541_v36  ;;  %vm1050_vm3 = vcmp.gt.s32.totalorder %v1047_v43, %v1539_v35 }
 0x8ec   : >> { %v1057_v45 = vsel %vm1056_vm0, %v1053_v42, %v1541_v36  ;;  %v1051_v54 = vsel %vm1050_vm3, %v1047_v43, %v1539_v35 }
 0x8ed   : >> { %vm1064_vm1 = vcmp.lt.s32.totalorder %v1049_v44, %v1057_v45 }
 0x8ee   : >> { %v1065_v51 = vsel %vm1064_vm1, %v1049_v44, %v1057_v45  ;;  %v1055_v52 = vpop.permute.xlu1 %1054 }
 0x8ef   : >> { %vm1068_vm6 = vcmp.lt.s32.totalorder %v1061_v50, %v1065_v51  ;;  %vm1058_vm7 = vcmp.gt.s32.totalorder %v1055_v52, %v1541_v36 }
 0x8f0   : >> { %v1069_v53 = vsel %vm1068_vm6, %v1061_v50, %v1065_v51  ;;  %v1059_v55 = vsel %vm1058_vm7, %v1055_v52, %v1541_v36 }
 0x8f1   : >> { %vm1072_vm9 = vcmp.gt.s32.totalorder %v1069_v53, %v1528_v20  ;;  %vm1066_vm10 = vcmp.lt.s32.totalorder %v1051_v54, %v1059_v55 }
 0x8f2   : >> { %v1073_v56 = vsel %vm1072_vm9, %v1069_v53, %v1528_v20  ;;  %v1067_v58 = vsel %vm1066_vm10, %v1051_v54, %v1059_v55 }
 0x8f3   : >> { %vm1076_vm11 = vcmp.lt.s32.totalorder %v1025_v24, %v1073_v56  ;;  %vm1070_vm12 = vcmp.lt.s32.totalorder %v1063_v57, %v1067_v58 }
 0x8f4   : >> { %v1071_v59 = vsel %vm1070_vm12, %v1063_v57, %v1067_v58  ;;  %v1077_v61 = vsel %vm1076_vm11, %v1025_v24, %v1073_v56  }
 0x8f5   : >> { %vm1074_vm13 = vcmp.gt.s32.totalorder %v1071_v59, %v1519_v17  ;;  %v1080_v63 = vsub.s32 %v1442_v21, %v1077_v61 }
 0x8f6   : >> { %v1075_v60 = vsel %vm1074_vm13, %v1071_v59, %v1519_v17 }
 0x8f7   : >> { %vm1078_vm14 = vcmp.lt.s32.totalorder %v1027_v26, %v1075_v60 }
 0x8f8   : >> { %v1079_v62 = vsel %vm1078_vm14, %v1027_v26, %v1075_v60  }
 0x8f9   : >> { %v1081_v0 = vsub.s32 %v1438_v19, %v1079_v62 }
 0x8fb   : >> { %vm1082_vm15 = vcmp.gt.s32.totalorder %v1080_v63, %v1081_v0 }
 0x8fc   : >> { %v1083_v4 = vsel %vm1082_vm15, %v1080_v63, %v1081_v0 }
 0x8fd   : >> { %v1085_v5 = vshra.s32 %v1083_v4, 16  ;;  %v1084_v7 = vand.u32 65535, %v1083_v4 }
 0x8ff   : >> { %v1087_v6 = vcvt.s32.f32 %v1085_v5  ;;  %v1086_v10 = vcvt.s32.f32 %v1084_v7 }
 0x901   : >> { %1088 = vmax.xlane.f32.xlu0 %v1087_v6 }
 0x98e   : >> { %v1089_v8 = vpop.xlane.xlu0 %1088 }
 0x98f   : >> { %vm1090_vm0 = vcmp.eq.f32.partialorder %v1087_v6, %v1089_v8  ;;  %v1095_v15 = vcvt.f32.s32 %v1089_v8 }
 0x990   : >> { %v1091_v13 = vsel %vm1090_vm0, %v1086_v10, -inf }
 0x991   : >> { %1092 = vmax.xlane.f32.xlu1 %v1091_v13  ;;  %v1096_v18 = vshll.u32 %v1095_v15, 16 }
 0xa1e   : >> { %v1093_v16 = vpop.xlane.xlu1 %1092 }
 0xa1f   : >> { %v1094_v22 = vcvt.f32.s32 %v1093_v16 }
 0xa21   : >> { %v1097_v23 = vadd.s32 %v1096_v18, %v1094_v22 }
 0xa23   : >> { %v1098_v21 = vrot.slane %v1097_v23, 4 }
 0xa25   : >> { %vm1099_vm4 = vcmp.gt.s32.totalorder %v1097_v23, %v1098_v21 }
 0xa26   : >> { %v1100_v19 = vsel %vm1099_vm4, %v1097_v23, %v1098_v21  ;;  %v2153_v21 = vmov %v1077_v61 }
 0xa27   : >> { %v1101_v24 = vrot.slane %v1100_v19, 2 }
 0xa29   : >> { %vm1102_vm1 = vcmp.gt.s32.totalorder %v1100_v19, %v1101_v24 }
 0xa2a   : >> { %v1103_v25 = vsel %vm1102_vm1, %v1100_v19, %v1101_v24  ;;  %v2152_v19 = vmov %v1079_v62 }
 0xa2b   : >> { %v1104_v26 = vrot.slane %v1103_v25, 1 }
 0xa2d   : >> { %vm1105_vm3 = vcmp.gt.s32.totalorder %v1103_v25, %v1104_v26 }
 0xa2e   : >> { %v1106_v27 = vsel %vm1105_vm3, %v1103_v25, %v1104_v26 }
 0xa2f   : >> { %1345 = vpush %v1106_v27 }
 0xa60   : >> { %s1346_s27 = spop %1345 }
 0xa61   : >> { %p1108_p6 = scmp.gt.s32.totalorder %s1346_s27, 0 }
 0xa63   : >> { %p242_p8 = pnand %p1108_p6, %p241_p7 }
 0xa64   : > { %v2154_v51 = vmov (%p242_p8), %v1079_v62  ;;  %v2155_v52 = vmov (%p242_p8), %v1077_v61 }
 0xa65   : > { %245 = sbr.rel (!%p242_p8) target bundleno = 232 (0xe8), region = 68 }
 0xa6c PF: > { %1406 = vset.pattern.permute.xlu0 %v1456_v1  ;;  %v1119_v28 = vmul.u32 8, %v1493_v3  ;;  %1407 = vset.pattern.permute.xlu1 %v1456_v1  ;;  %v1460_v36 = vmov 0.0   ;;  %vm1110_vm9 = vcmp.eq.s32.totalorder %v1454_v52, %v1503_v9  ;;  %vm1111_vm10 = vcmp.eq.s32.totalorder %v1450_v51, %v1512_v14  ;;  %v1201_v30 = vld [vmem:[%s1549_s19] sm:$0xff]  ;;  %v1454_v52 = vphi %v2151_v52, %v2155_v52   ;;  %v1450_v51 = vphi %v2150_v51, %v2154_v51  }
 0xa6d   : > { %1337 = vmatprep.subr.bf16.mxu0 %v1460_v36  ;;  %vm1112_vm11 = vmand %vm164_vm5, %vm1110_vm9  ;;  %v1461_v1 = vmov 1.0|1.0   ;;  %vm1462_vm14 = vmmov 0   ;;  %vm1141_vm0 = vcmask 130048   ;;  %vm1203_vm4 = vcmp.gt.f32.partialorder %v1201_v30, 0.0 }
 0xa6e   : > { %vm1120_vm6 = vcmp.ge.s32.totalorder %v1491_v2, %v1119_v28  ;;  %v1121_v29 = vadd.s32 8, %v1119_v28  ;;  %vm1113_vm12 = vmand %vm165_vm2, %vm1111_vm10  ;;  %1339 = vmatprep.mubr.msk.bf16.mxu0 %vm1462_vm14, %v1460_v36  ;;  %v1330_v31 = vsel %vm1203_vm4, 1.0, %v1460_v36  ;;  %v1202_v43 = vcvt.s32.f32 %v1493_v3 }
 0xa6f   : > { %vm1326_vm13 = vmpackc.low %vm1113_vm12, %vm1112_vm11  ;;  %vm1221_vm9 = vcmask 7168  }
 0xa70   : > { %vm1122_vm7 = vcmp.lt.s32.totalorder %v1491_v2, %v1121_v29  ;;  %1338 = vmatpush3.bf16.msk.msra.mxu0 %vm1326_vm13, %v1461_v1 }
 0xa71   : > { %vm1123_vm8 = vmand %vm1120_vm6, %vm1122_vm7 }
 0xa72   : > { %v1124_v17 = vsel %vm1123_vm8, %v1493_v3, 0 }
 0xa73   : > { %v1127_v20 = vmul.u32 16, %v1124_v17  ;;  %v1125_v39 = vmul.u32 8, %v1124_v17 }
 0xa75   : > { %1129 = vperm.xlu0 %1406, %v1127_v20   ;;  %v1132_v35 = vadd.s32 16, %v1127_v20  ;;  %v1126_v40 = vsub.s32 %v1491_v2, %v1125_v39 }
 0xa77   : > { %v1185_v48 = vmul.u32 16, %v1126_v40 }
 0xa79   : > { %1134 = vperm.xlu0 %1406, %v1132_v35   ;;  %1187 = vperm.xlu1 %1407, %v1185_v48   ;;  %v1190_v9 = vadd.s32 16, %v1185_v48 }
 0xa7d   : > { %1192 = vperm.xlu1 %1407, %v1190_v9  }
 0xaa1   : > { %1206 = vadd.xlane.f32.xlu1 %v1330_v31 }
 0xaf4   : > { %v1130_v14 = vpop.permute.xlu0 %1129 }
 0xaf5   : > { %vm1131_vm5 = vcmp.ge.s32.totalorder %v1493_v3, %v1130_v14 }
 0xaf8   : > { %v1135_v49 = vpop.permute.xlu0 %1134  ;;  %v1188_v2 = vpop.permute.xlu1 %1187 }
 0xaf9   : > { %vm1136_vm15 = vcmp.lt.s32.totalorder %v1493_v3, %v1135_v49  ;;  %vm1189_vm1 = vcmp.ge.s32.totalorder %v1493_v3, %v1188_v2 }
 0xafa   : > { %vm1137_vm2 = vmand %vm1131_vm5, %vm1136_vm15 }
 0xafb   : > { %v1325_v11 = vsel %vm1137_vm2, 1.0, %v1460_v36 }
 0xafc   : > { %v1140_v12 = vpack.c.bf16 %v1325_v11, %v1325_v11  ;;  %v1193_v32 = vpop.permute.xlu1 %1192 }
 0xafd   : > { %vm1194_vm3 = vcmp.lt.s32.totalorder %v1493_v3, %v1193_v32 }
 0xafe   : > { %1340 = vmatmul.mubr.msk.bf16.vlgmr.msra.gmra.mrb[0].mxu0 %vm1141_vm0, %v1140_v12  ;;  %vm1195_vm6 = vmand %vm1189_vm1, %vm1194_vm3 }
 0xaff   : > { %v1329_v34 = vsel %vm1195_vm6, 1.0, %v1460_v36 }
 0xb2e   : > { %v1207_v44 = vpop.xlane.xlu1 %1206 }
 0xb2f   : > { %vm1211_vm8 = vcmp.lt.f32.partialorder %v1202_v43, %v1207_v44 }
 0xb30   : > { %v1332_v50 = vsel %vm1211_vm8, 1.0, %v1460_v36 }
 0xbd1   : > { %v1179_v33 = vpop.f32.mrb[0].mxu0 }
 0xbd2   : > { %v1198_v37 = vmul.f32 %v1329_v34, %v1179_v33  ;;  %v1341_v38 = vpop.f32.mrb[1].mxu0 }
 0xbd3   : > { %v1182_v41 = vpop.f32.mrb[2].mxu0 }
 0xbd4   : > { %1199 = vadd.xlane.f32.xlu0 %v1198_v37  ;;  %v1342_v42 = vpop.f32.mrb[3].mxu0 }
 0xc61   : > { %v1200_v45 = vpop.xlane.xlu0 %1199 }
 0xc62   : > { %vm1208_vm7 = vcmp.lt.f32.partialorder %v1202_v43, %v1200_v45  ;;  %vm1219_vm10 = vcmp.gt.f32.partialorder %v1200_v45, 0.0 }
 0xc63   : > { %v1331_v46 = vsel %vm1208_vm7, 1.0, %v1460_v36 }
 0xc64   : > { %v1214_v47 = vsub.f32 %v1201_v30, %v1331_v46 }
 0xc66   : > { %v1215_v51 = vand.u32 2147483647, %v1214_v47 }
 0xc68   : > { %v1216_v52 = vmul.f32 %v1332_v50, %v1215_v51 }
 0xc6a   : > { %1217 = vadd.xlane.f32.xlu0 %v1216_v52 }
 0xcf7   : > { %v1218_v53 = vpop.xlane.xlu0 %1217 }
 0xcf8   : > { %v1220_v54 = vsel %vm1219_vm10, %v1218_v53, 0.0 }
 0xcf9   : > { %v1222_v55 = vsel %vm1221_vm9, %v1220_v54, 0.0 }
 0xcfa   : > { %1223 = vadd.xlane.f32.xlu0 %v1222_v55 }
 0xd87   : > { %v1224_v56 = vpop.xlane.xlu0 %1223 }
 0xd88   : > { %v1225_v57 = vrot.slane %v1224_v56, 4 }
 0xd8a   : > { %v1226_v3 = vadd.f32 %v1225_v57, %v1224_v56 }
 0xd8c   : > { %v1227_v58 = vrot.slane %v1226_v3, 2 }
 0xd8e   : > { %v1228_v59 = vadd.f32 %v1227_v58, %v1226_v3 }
 0xd90   : > { %v1229_v60 = vrot.slane %v1228_v59, 1 }
 0xd92   : > { %v1230_v61 = vadd.f32 %v1229_v60, %v1228_v59 }
 0xd94   : > { %1347 = vpush %v1230_v61 }
 0xdc5   : > { %s1348_s28 = spop %1347 }
 0xdc6   : > { %v1232_v62 = vstv %s1348_s28 }
 0xdc7   : > { %1234 = vst [vmem:[%s1554_s22] sm:$0xff] %v1232_v62 }
 0xdc8 PF: > { %s12_s9 = sadd.s32 1, %s1434_s9  }
 0xdc9   : > { %p9_p9 = scmp.ge.s32.totalorder %s12_s9, 4  }
 0xdcb   :  { %11 = sbr.rel (!%p9_p9) target bundleno = 1 (0x1), region = 79 }

</bundles_post_ra>
